<compile_context>
chip_gen: v7x
topology: tpu7x:2x2x1
jax: 0.10.0
libtpu: 0.0.40
codegen_flags: <defaults>
</compile_context>

<pallas_src>
import math
import functools

import jax
import jax.numpy as jnp
from jax.experimental import pallas as pl
from jax.experimental.pallas import tpu as pltpu


def _block_kernel(
    x_ref, kh_ref, vh_ref,
    g2_ref, b2_ref, wq_ref, wo_ref, bo_ref,
    g3_ref, b3_ref, wg_ref, bg_ref, w2_ref, bf2_ref,
    out_ref,
    *, heads, d_head, ff_inner,
):
    f32 = jnp.float32
    cdt = x_ref.dtype                      # matmul-input dtype (bf16 stays bf16)
    x32 = x_ref[...].astype(f32)           # (TQ, dim) — residual / statistics in f32

    def layernorm(h32, g_ref, b_ref):
        mu = jnp.mean(h32, axis=-1, keepdims=True)
        var = jnp.mean(jnp.square(h32 - mu), axis=-1, keepdims=True)
        return ((h32 - mu) * jax.lax.rsqrt(var + 1e-5)
                * g_ref[...].astype(f32) + b_ref[...].astype(f32))

    # ---------------- CrossAttention(norm2(x), context) + x -----------------
    h = layernorm(x32, g2_ref, b2_ref).astype(cdt)
    # Full-width projection (K = dim); softmax scale already folded into wq.
    q = jnp.dot(h, wq_ref[...], preferred_element_type=f32).astype(cdt)   # (TQ, inner)

    # (TQ, H*Dh) -> (H, TQ, Dh).  Static lane slices + one leading-dim stack:
    # only q needs splitting now (K/V arrive pre-split); a (1,0,2) transpose of
    # the matmul output is not reliably lowerable, so keep the safe form.
    qh = jnp.stack([q[:, i * d_head:(i + 1) * d_head] for i in range(heads)], axis=0)

    kh = kh_ref[...]                       # (H, M, Dh) — resident per batch
    vh = vh_ref[...]                       # (H, M, Dh)

    # Batched QK^T (no transpose materialized) and batched PV.
    sim = jnp.einsum('hnd,hmd->hnm', qh, kh, preferred_element_type=f32)
    sim = sim - jnp.max(sim, axis=-1, keepdims=True)
    p = jnp.exp(sim)
    p = p * pl.reciprocal(jnp.sum(p, axis=-1, keepdims=True), approx=True)
    oh = jnp.einsum('hnm,hmd->hnd', p.astype(cdt), vh,
                    preferred_element_type=f32)                 # (H, TQ, Dh) f32

    # Merge heads with a single lane concat (no masked scratch stores, no
    # scratch reload); output projection stays one K = H*Dh matmul.
    o = jnp.concatenate([oh[i] for i in range(heads)], axis=-1).astype(cdt)
    attn = (jnp.dot(o, wo_ref[...], preferred_element_type=f32)
            + bo_ref[...].astype(f32))
    x32 = x32 + attn                                            # residual

    # ---------------- FeedForward (GEGLU): ff(norm3(x)) + x ------------------
    h2 = layernorm(x32, g3_ref, b3_ref).astype(cdt)
    proj = (jnp.dot(h2, wg_ref[...], preferred_element_type=f32)
            + bg_ref[...].astype(f32))                          # (TQ, 2*ff_inner)
    a = proj[:, :ff_inner]
    gate = proj[:, ff_inner:]
    # exact (erf) GELU, matching torch.nn.functional.gelu default
    gelu_gate = 0.5 * gate * (1.0 + jax.lax.erf(gate * (1.0 / math.sqrt(2.0))))
    ffh = (a * gelu_gate).astype(cdt)
    ff = (jnp.dot(ffh, w2_ref[...], preferred_element_type=f32)
          + bf2_ref[...].astype(f32))
    out_ref[...] = (x32 + ff).astype(out_ref.dtype)


def _vmem_capacity_bytes():
    """Per-core VMEM capacity; conservative fallback (v7x) if the query fails."""
    try:
        cap = getattr(pltpu.get_tpu_info(), "vmem_capacity_bytes", None)
        if cap:
            return int(cap)
    except Exception:
        pass
    return 64 << 20


def _resident_spec(shape):
    """Whole-array BlockSpec with constant block index; single-buffered when
    the running JAX version supports pipeline_mode (block index never changes,
    so double buffering would only waste VMEM — important on v7x)."""
    nd = len(shape)
    idx = lambda b, i, _nd=nd: (0,) * _nd
    try:
        return pl.BlockSpec(shape, idx, pipeline_mode=pl.Buffered(1))
    except (TypeError, AttributeError, ValueError):
        return pl.BlockSpec(shape, idx)


def basic_transformer_block(x, context, params, *, n_heads, d_head,
                            q_tile=None, param_dtype=None):
    """x: (B, N, dim), context: (B, M, context_dim)."""
    B, N, dim = x.shape
    _, M, cdim = context.shape
    inner = n_heads * d_head
    ff_inner = dim * 4
    scale = d_head ** (-0.5)
    f32 = jnp.float32
    cdt = x.dtype

    (g2, b2, wq, wk, wv, wo, bo, g3, b3, wg, bg, w2, b2f) = params

    # Big matrices match the activation dtype (fast bf16 MXU path, half the
    # weight DMA/VMEM when activations are bf16); LN/bias params stay f32.
    wdt = cdt if param_dtype is None else param_dtype
    wq = (wq.astype(f32) * scale).astype(wdt)        # fold softmax scale (f32, then cast)
    wk = wk.astype(wdt)
    wv = wv.astype(wdt)
    wo = wo.astype(wdt)
    wg = wg.astype(wdt)
    w2 = w2.astype(wdt)
    g2, b2, bo, g3, b3, bg, b2f = (p.astype(f32) for p in (g2, b2, bo, g3, b3, bg, b2f))

    # K/V depend only on the batch index — compute them ONCE with XLA (cheap),
    # pre-split into heads, and pass as per-batch resident kernel inputs.
    hp = jax.lax.Precision.HIGHEST
    k = jnp.einsum('bmc,ci->bmi', context.astype(wdt), wk,
                   preferred_element_type=f32, precision=hp)
    v = jnp.einsum('bmc,ci->bmi', context.astype(wdt), wv,
                   preferred_element_type=f32, precision=hp)
    kh = k.reshape(B, M, n_heads, d_head).transpose(0, 2, 1, 3).astype(cdt)
    vh = v.reshape(B, M, n_heads, d_head).transpose(0, 2, 1, 3).astype(cdt)

    weights = (g2, b2, wq, wo, bo, g3, b3, wg, bg, w2, b2f)
    weight_bytes = sum(int(p.size) * p.dtype.itemsize for p in weights)
    isz = x.dtype.itemsize
    r8 = lambda n: -(-n // 8) * 8
    dh_pad = -(-d_head // 128) * 128                 # lane padding of the head dim

    def est(tq):
        kv = 2 * 2 * isz * n_heads * r8(M) * dh_pad  # kh + vh (double-buffered)
        xio = 2 * 2 * isz * tq * dim                 # x tile + out tile (double-buffered)
        wb = 2 * weight_bytes                        # conservative: assume x2 buffers
        tmp = 4 * (4 * tq * dim                      # x32, attn, residual, ff (f32)
                   + 4 * tq * inner                  # q, qh, oh, merged o
                   + 2 * n_heads * tq * r8(M)        # sim, p
                   + 6 * tq * ff_inner)              # proj, a/gate, gelu, ffh
        return kv + xio + wb + tmp + (8 << 20)       # Mosaic internal-scratch slack

    cap = _vmem_capacity_bytes()
    budget = max(cap - (16 << 20), 32 << 20)         # ~112 MiB v5e/v6e, ~48 MiB v7x
    tq = min(N, 512 if q_tile is None else q_tile)
    if tq != N and tq % 8:                           # keep block shape (8,·)-legal
        tq = max(8, (tq // 8) * 8)
    while tq > 8 and est(tq) > budget:               # shrink tile until it fits
        tq = max(8, ((tq // 2) // 8) * 8)
    vmem_limit = int(min(max(est(tq), 32 << 20), budget, cap))
    nq = pl.cdiv(N, tq)

    in_specs = [
        pl.BlockSpec((None, tq, dim), lambda b, i: (b, i, 0)),                  # x tile
        pl.BlockSpec((None, n_heads, M, d_head), lambda b, i: (b, 0, 0, 0)),    # K heads
        pl.BlockSpec((None, n_heads, M, d_head), lambda b, i: (b, 0, 0, 0)),    # V heads
    ] + [_resident_spec(p.shape) for p in weights]

    kernel = functools.partial(_block_kernel, heads=n_heads, d_head=d_head,
                               ff_inner=ff_inner)

    return pl.pallas_call(
        kernel,
        out_shape=jax.ShapeDtypeStruct((B, N, dim), x.dtype),
        grid_spec=pltpu.PrefetchScalarGridSpec(
            num_scalar_prefetch=0,
            grid=(B, nq),
            in_specs=in_specs,
            out_specs=pl.BlockSpec((None, tq, dim), lambda b, i: (b, i, 0)),
        ),
        compiler_params=pltpu.CompilerParams(
            dimension_semantics=("parallel", "parallel"),
            vmem_limit_bytes=vmem_limit),
    )(x, kh, vh, *weights)


# -------------------- pure-JAX reference (for verification) --------------------
def reference_block(x, context, params, *, n_heads, d_head):
    (g2, b2, wq, wk, wv, wo, bo, g3, b3, wg, bg, w2, b2f) = params
    B, N, dim = x.shape
    ff_inner = dim * 4
    scale = d_head ** (-0.5)

    def ln(h, g, b):
        mu = jnp.mean(h, axis=-1, keepdims=True)
        var = jnp.mean((h - mu) ** 2, axis=-1, keepdims=True)
        return (h - mu) / jnp.sqrt(var + 1e-5) * g + b

    with jax.default_matmul_precision("highest"):
        h = ln(x, g2[0], b2[0])
        q = h @ wq
        k = context @ wk
        v = context @ wv
        q = q.reshape(B, N, n_heads, d_head).transpose(0, 2, 1, 3)
        k = k.reshape(B, -1, n_heads, d_head).transpose(0, 2, 1, 3)
        v = v.reshape(B, -1, n_heads, d_head).transpose(0, 2, 1, 3)
        sim = jnp.einsum("bhid,bhjd->bhij", q, k) * scale
        attn = jax.nn.softmax(sim, axis=-1)
        o = jnp.einsum("bhij,bhjd->bhid", attn, v)
        o = o.transpose(0, 2, 1, 3).reshape(B, N, n_heads * d_head)
        x = x + (o @ wo + bo[0])

        h = ln(x, g3[0], b3[0])
        proj = h @ wg + bg[0]
        a, gate = proj[..., :ff_inner], proj[..., ff_inner:]
        gelu_gate = 0.5 * gate * (1.0 + jax.lax.erf(gate / math.sqrt(2.0)))
        x = x + ((a * gelu_gate) @ w2 + b2f[0])
    return x


if __name__ == "__main__":
    # Small but lane-friendly shapes: dim=128 and ff_inner=512 keep the GEGLU
    # split and the merged attention output 128-lane aligned.
    B, N, M = 2, 16, 32
    dim, cdim = 128, 64
    n_heads, d_head = 4, 32
    inner = n_heads * d_head
    ff_inner = dim * 4

    key = jax.random.PRNGKey(0)
    keys = jax.random.split(key, 16)

    x = jax.random.normal(keys[0], (B, N, dim), jnp.float32)
    context = jax.random.normal(keys[1], (B, M, cdim), jnp.float32)

    s = 0.05
    params = (
        jnp.ones((1, dim), jnp.float32) + s * jax.random.normal(keys[2], (1, dim)),   # g2
        s * jax.random.normal(keys[3], (1, dim)),                                     # b2
        s * jax.random.normal(keys[4], (dim, inner)),                                 # wq
        s * jax.random.normal(keys[5], (cdim, inner)),                                # wk
        s * jax.random.normal(keys[6], (cdim, inner)),                                # wv
        s * jax.random.normal(keys[7], (inner, dim)),                                 # wo
        s * jax.random.normal(keys[8], (1, dim)),                                     # bo
        jnp.ones((1, dim), jnp.float32) + s * jax.random.normal(keys[9], (1, dim)),   # g3
        s * jax.random.normal(keys[10], (1, dim)),                                    # b3
        s * jax.random.normal(keys[11], (dim, 2 * ff_inner)),                         # wg (GEGLU proj)
        s * jax.random.normal(keys[12], (1, 2 * ff_inner)),                           # bg
        s * jax.random.normal(keys[13], (ff_inner, dim)),                             # w2
        s * jax.random.normal(keys[14], (1, dim)),                                    # b2f
    )

    out = basic_transformer_block(x, context, params, n_heads=n_heads, d_head=d_head)
    out = jax.block_until_ready(out)

    ref = reference_block(x, context, params, n_heads=n_heads, d_head=d_head)
    assert out.shape == (B, N, dim)
    max_err = float(jnp.max(jnp.abs(out - ref)))
    # Tolerance covers pl.reciprocal(approx=True) in the softmax denominator.
    assert jnp.allclose(out, ref, atol=2e-3, rtol=2e-3), \
        f"mismatch vs reference, max abs err={max_err}"

    print("KERNEL_OK")
</pallas_src>

<mosaic_0001>
module attributes {stable_mosaic.version = 11 : i64} {
  func.func @_block_kernel(%arg0: i32, %arg1: i32, %arg2: memref<1x16x128xf32, #tpu.memory_space<vmem>>, %arg3: memref<1x4x32x32xf32, #tpu.memory_space<vmem>>, %arg4: memref<1x4x32x32xf32, #tpu.memory_space<vmem>>, %arg5: memref<1x128xf32, #tpu.memory_space<vmem>>, %arg6: memref<1x128xf32, #tpu.memory_space<vmem>>, %arg7: memref<128x128xf32, #tpu.memory_space<vmem>>, %arg8: memref<128x128xf32, #tpu.memory_space<vmem>>, %arg9: memref<1x128xf32, #tpu.memory_space<vmem>>, %arg10: memref<1x128xf32, #tpu.memory_space<vmem>>, %arg11: memref<1x128xf32, #tpu.memory_space<vmem>>, %arg12: memref<128x1024xf32, #tpu.memory_space<vmem>>, %arg13: memref<1x1024xf32, #tpu.memory_space<vmem>>, %arg14: memref<512x128xf32, #tpu.memory_space<vmem>>, %arg15: memref<1x128xf32, #tpu.memory_space<vmem>>, %arg16: memref<1x16x128xf32, #tpu.memory_space<vmem>>) attributes {dimension_semantics = [#tpu.dimension_semantics<parallel>, #tpu.dimension_semantics<parallel>], iteration_bounds = array<i64: 2, 1>, scalar_prefetch = 0 : i64, scratch_operands = 0 : i64, tpu.core_type = #tpu.core_type<tc>, window_params = [{transform_indices = @transform_0, window_bounds = array<i64: 1, 16, 128>}, {transform_indices = @transform_1, window_bounds = array<i64: 1, 4, 32, 32>}, {transform_indices = @transform_2, window_bounds = array<i64: 1, 4, 32, 32>}, {pipeline_mode = #tpu.pipeline_mode<synchronous>, transform_indices = @transform_3, window_bounds = array<i64: 1, 128>}, {pipeline_mode = #tpu.pipeline_mode<synchronous>, transform_indices = @transform_4, window_bounds = array<i64: 1, 128>}, {pipeline_mode = #tpu.pipeline_mode<synchronous>, transform_indices = @transform_5, window_bounds = array<i64: 128, 128>}, {pipeline_mode = #tpu.pipeline_mode<synchronous>, transform_indices = @transform_6, window_bounds = array<i64: 128, 128>}, {pipeline_mode = #tpu.pipeline_mode<synchronous>, transform_indices = @transform_7, window_bounds = array<i64: 1, 128>}, {pipeline_mode = #tpu.pipeline_mode<synchronous>, transform_indices = @transform_8, window_bounds = array<i64: 1, 128>}, {pipeline_mode = #tpu.pipeline_mode<synchronous>, transform_indices = @transform_9, window_bounds = array<i64: 1, 128>}, {pipeline_mode = #tpu.pipeline_mode<synchronous>, transform_indices = @transform_10, window_bounds = array<i64: 128, 1024>}, {pipeline_mode = #tpu.pipeline_mode<synchronous>, transform_indices = @transform_11, window_bounds = array<i64: 1, 1024>}, {pipeline_mode = #tpu.pipeline_mode<synchronous>, transform_indices = @transform_12, window_bounds = array<i64: 512, 128>}, {pipeline_mode = #tpu.pipeline_mode<synchronous>, transform_indices = @transform_13, window_bounds = array<i64: 1, 128>}, {transform_indices = @transform_14, window_bounds = array<i64: 1, 16, 128>}]} {
    %c0 = arith.constant 0 : index
    %c0_0 = arith.constant 0 : index
    %c0_1 = arith.constant 0 : index
    %0 = vector.load %arg2[%c0, %c0_0, %c0_1] : memref<1x16x128xf32, #tpu.memory_space<vmem>>, vector<1x16x128xf32>
    %1 = vector.shape_cast %0 : vector<1x16x128xf32> to vector<16x128xf32>
    %cst = arith.constant dense<0.000000e+00> : vector<16xf32>
    %2 = vector.multi_reduction <add>, %1, %cst [1] : vector<16x128xf32> to vector<16xf32>
    %3 = vector.shape_cast %2 : vector<16xf32> to vector<16x1xf32>
    %cst_2 = arith.constant 1.280000e+02 : f32
    %4 = vector.broadcast %cst_2 : f32 to vector<16x1xf32>
    %5 = arith.divf %3, %4 : vector<16x1xf32>
    %6 = vector.broadcast %5 : vector<16x1xf32> to vector<16x128xf32>
    %7 = arith.subf %1, %6 : vector<16x128xf32>
    %8 = arith.mulf %7, %7 : vector<16x128xf32>
    %cst_3 = arith.constant dense<0.000000e+00> : vector<16xf32>
    %9 = vector.multi_reduction <add>, %8, %cst_3 [1] : vector<16x128xf32> to vector<16xf32>
    %10 = vector.shape_cast %9 : vector<16xf32> to vector<16x1xf32>
    %cst_4 = arith.constant 1.280000e+02 : f32
    %11 = vector.broadcast %cst_4 : f32 to vector<16x1xf32>
    %12 = arith.divf %10, %11 : vector<16x1xf32>
    %13 = vector.broadcast %5 : vector<16x1xf32> to vector<16x128xf32>
    %14 = arith.subf %1, %13 : vector<16x128xf32>
    %cst_5 = arith.constant 9.99999974E-6 : f32
    %15 = vector.broadcast %cst_5 : f32 to vector<16x1xf32>
    %16 = arith.addf %12, %15 : vector<16x1xf32>
    %17 = math.rsqrt %16 : vector<16x1xf32>
    %18 = vector.broadcast %17 : vector<16x1xf32> to vector<16x128xf32>
    %19 = arith.mulf %14, %18 : vector<16x128xf32>
    %c0_6 = arith.constant 0 : index
    %c0_7 = arith.constant 0 : index
    %20 = vector.load %arg5[%c0_6, %c0_7] : memref<1x128xf32, #tpu.memory_space<vmem>>, vector<1x128xf32>
    %21 = vector.broadcast %20 : vector<1x128xf32> to vector<16x128xf32>
    %22 = arith.mulf %19, %21 : vector<16x128xf32>
    %c0_8 = arith.constant 0 : index
    %c0_9 = arith.constant 0 : index
    %23 = vector.load %arg6[%c0_8, %c0_9] : memref<1x128xf32, #tpu.memory_space<vmem>>, vector<1x128xf32>
    %24 = vector.broadcast %23 : vector<1x128xf32> to vector<16x128xf32>
    %25 = arith.addf %22, %24 : vector<16x128xf32>
    %c0_10 = arith.constant 0 : index
    %c0_11 = arith.constant 0 : index
    %26 = vector.load %arg7[%c0_10, %c0_11] : memref<128x128xf32, #tpu.memory_space<vmem>>, vector<128x128xf32>
    %cst_12 = arith.constant dense<0.000000e+00> : vector<16x128xf32>
    %27 = tpu.matmul %25, %26, %cst_12 {dimension_numbers = #tpu.dot_dimension_numbers<[1], [0], [0], [1], [0, 0, 1, 1], [], []>} : vector<16x128xf32>, vector<128x128xf32>, vector<16x128xf32> -> vector<16x128xf32>
    %28 = vector.extract_strided_slice %27 {offsets = [0, 0], sizes = [16, 32], strides = [1, 1]} : vector<16x128xf32> to vector<16x32xf32>
    %29 = vector.extract_strided_slice %27 {offsets = [0, 32], sizes = [16, 32], strides = [1, 1]} : vector<16x128xf32> to vector<16x32xf32>
    %30 = vector.extract_strided_slice %27 {offsets = [0, 64], sizes = [16, 32], strides = [1, 1]} : vector<16x128xf32> to vector<16x32xf32>
    %31 = vector.extract_strided_slice %27 {offsets = [0, 96], sizes = [16, 32], strides = [1, 1]} : vector<16x128xf32> to vector<16x32xf32>
    %32 = vector.shape_cast %28 : vector<16x32xf32> to vector<1x16x32xf32>
    %33 = vector.shape_cast %29 : vector<16x32xf32> to vector<1x16x32xf32>
    %34 = vector.shape_cast %30 : vector<16x32xf32> to vector<1x16x32xf32>
    %35 = vector.shape_cast %31 : vector<16x32xf32> to vector<1x16x32xf32>
    %36 = tpu.concatenate %32, %33, %34, %35 in 0 : vector<1x16x32xf32>, vector<1x16x32xf32>, vector<1x16x32xf32>, vector<1x16x32xf32> -> vector<4x16x32xf32>
    %c0_13 = arith.constant 0 : index
    %c0_14 = arith.constant 0 : index
    %c0_15 = arith.constant 0 : index
    %c0_16 = arith.constant 0 : index
    %37 = vector.load %arg3[%c0_13, %c0_14, %c0_15, %c0_16] : memref<1x4x32x32xf32, #tpu.memory_space<vmem>>, vector<1x4x32x32xf32>
    %38 = vector.shape_cast %37 : vector<1x4x32x32xf32> to vector<4x32x32xf32>
    %c0_17 = arith.constant 0 : index
    %c0_18 = arith.constant 0 : index
    %c0_19 = arith.constant 0 : index
    %c0_20 = arith.constant 0 : index
    %39 = vector.load %arg4[%c0_17, %c0_18, %c0_19, %c0_20] : memref<1x4x32x32xf32, #tpu.memory_space<vmem>>, vector<1x4x32x32xf32>
    %40 = vector.shape_cast %39 : vector<1x4x32x32xf32> to vector<4x32x32xf32>
    "tpu.trace_start"() <{level = 10 : i32, message = "hnd,hmd->hnm"}> : () -> ()
    %cst_21 = arith.constant dense<0.000000e+00> : vector<4x16x32xf32>
    %41 = tpu.matmul %36, %38, %cst_21 {dimension_numbers = #tpu.dot_dimension_numbers<[2], [2], [1], [1], [0, 0, 0, 1, 1, 1], [0], [0]>} : vector<4x16x32xf32>, vector<4x32x32xf32>, vector<4x16x32xf32> -> vector<4x16x32xf32>
    "tpu.trace_stop"() : () -> ()
    %cst_22 = arith.constant dense<0xFF800000> : vector<4x16xf32>
    %42 = vector.multi_reduction <maximumf>, %41, %cst_22 [2] : vector<4x16x32xf32> to vector<4x16xf32>
    %43 = vector.shape_cast %42 : vector<4x16xf32> to vector<4x16x1xf32>
    %44 = vector.broadcast %43 : vector<4x16x1xf32> to vector<4x16x32xf32>
    %45 = arith.subf %41, %44 : vector<4x16x32xf32>
    %46 = math.exp %45 : vector<4x16x32xf32>
    %cst_23 = arith.constant dense<0.000000e+00> : vector<4x16xf32>
    %47 = vector.multi_reduction <add>, %46, %cst_23 [2] : vector<4x16x32xf32> to vector<4x16xf32>
    %48 = vector.shape_cast %47 : vector<4x16xf32> to vector<4x16x1xf32>
    %49 = tpu.reciprocal %48 {approx = true} : vector<4x16x1xf32> -> vector<4x16x1xf32>
    %50 = vector.broadcast %49 : vector<4x16x1xf32> to vector<4x16x32xf32>
    %51 = arith.mulf %46, %50 : vector<4x16x32xf32>
    "tpu.trace_start"() <{level = 10 : i32, message = "hnm,hmd->hnd"}> : () -> ()
    %cst_24 = arith.constant dense<0.000000e+00> : vector<4x16x32xf32>
    %52 = tpu.matmul %51, %40, %cst_24 {dimension_numbers = #tpu.dot_dimension_numbers<[2], [1], [1], [2], [0, 0, 0, 1, 1, 2], [0], [0]>} : vector<4x16x32xf32>, vector<4x32x32xf32>, vector<4x16x32xf32> -> vector<4x16x32xf32>
    "tpu.trace_stop"() : () -> ()
    %53 = vector.extract_strided_slice %52 {offsets = [0, 0, 0], sizes = [1, 16, 32], strides = [1, 1, 1]} : vector<4x16x32xf32> to vector<1x16x32xf32>
    %54 = vector.shape_cast %53 : vector<1x16x32xf32> to vector<16x32xf32>
    %55 = vector.extract_strided_slice %52 {offsets = [1, 0, 0], sizes = [1, 16, 32], strides = [1, 1, 1]} : vector<4x16x32xf32> to vector<1x16x32xf32>
    %56 = vector.shape_cast %55 : vector<1x16x32xf32> to vector<16x32xf32>
    %57 = vector.extract_strided_slice %52 {offsets = [2, 0, 0], sizes = [1, 16, 32], strides = [1, 1, 1]} : vector<4x16x32xf32> to vector<1x16x32xf32>
    %58 = vector.shape_cast %57 : vector<1x16x32xf32> to vector<16x32xf32>
    %59 = vector.extract_strided_slice %52 {offsets = [3, 0, 0], sizes = [1, 16, 32], strides = [1, 1, 1]} : vector<4x16x32xf32> to vector<1x16x32xf32>
    %60 = vector.shape_cast %59 : vector<1x16x32xf32> to vector<16x32xf32>
    %61 = tpu.concatenate %54, %56, %58, %60 in 1 : vector<16x32xf32>, vector<16x32xf32>, vector<16x32xf32>, vector<16x32xf32> -> vector<16x128xf32>
    %c0_25 = arith.constant 0 : index
    %c0_26 = arith.constant 0 : index
    %62 = vector.load %arg8[%c0_25, %c0_26] : memref<128x128xf32, #tpu.memory_space<vmem>>, vector<128x128xf32>
    %cst_27 = arith.constant dense<0.000000e+00> : vector<16x128xf32>
    %63 = tpu.matmul %61, %62, %cst_27 {dimension_numbers = #tpu.dot_dimension_numbers<[1], [0], [0], [1], [0, 0, 1, 1], [], []>} : vector<16x128xf32>, vector<128x128xf32>, vector<16x128xf32> -> vector<16x128xf32>
    %c0_28 = arith.constant 0 : index
    %c0_29 = arith.constant 0 : index
    %64 = vector.load %arg9[%c0_28, %c0_29] : memref<1x128xf32, #tpu.memory_space<vmem>>, vector<1x128xf32>
    %65 = vector.broadcast %64 : vector<1x128xf32> to vector<16x128xf32>
    %66 = arith.addf %63, %65 : vector<16x128xf32>
    %67 = arith.addf %1, %66 : vector<16x128xf32>
    %cst_30 = arith.constant dense<0.000000e+00> : vector<16xf32>
    %68 = vector.multi_reduction <add>, %67, %cst_30 [1] : vector<16x128xf32> to vector<16xf32>
    %69 = vector.shape_cast %68 : vector<16xf32> to vector<16x1xf32>
    %cst_31 = arith.constant 1.280000e+02 : f32
    %70 = vector.broadcast %cst_31 : f32 to vector<16x1xf32>
    %71 = arith.divf %69, %70 : vector<16x1xf32>
    %72 = vector.broadcast %71 : vector<16x1xf32> to vector<16x128xf32>
    %73 = arith.subf %67, %72 : vector<16x128xf32>
    %74 = arith.mulf %73, %73 : vector<16x128xf32>
    %cst_32 = arith.constant dense<0.000000e+00> : vector<16xf32>
    %75 = vector.multi_reduction <add>, %74, %cst_32 [1] : vector<16x128xf32> to vector<16xf32>
    %76 = vector.shape_cast %75 : vector<16xf32> to vector<16x1xf32>
    %cst_33 = arith.constant 1.280000e+02 : f32
    %77 = vector.broadcast %cst_33 : f32 to vector<16x1xf32>
    %78 = arith.divf %76, %77 : vector<16x1xf32>
    %79 = vector.broadcast %71 : vector<16x1xf32> to vector<16x128xf32>
    %80 = arith.subf %67, %79 : vector<16x128xf32>
    %cst_34 = arith.constant 9.99999974E-6 : f32
    %81 = vector.broadcast %cst_34 : f32 to vector<16x1xf32>
    %82 = arith.addf %78, %81 : vector<16x1xf32>
    %83 = math.rsqrt %82 : vector<16x1xf32>
    %84 = vector.broadcast %83 : vector<16x1xf32> to vector<16x128xf32>
    %85 = arith.mulf %80, %84 : vector<16x128xf32>
    %c0_35 = arith.constant 0 : index
    %c0_36 = arith.constant 0 : index
    %86 = vector.load %arg10[%c0_35, %c0_36] : memref<1x128xf32, #tpu.memory_space<vmem>>, vector<1x128xf32>
    %87 = vector.broadcast %86 : vector<1x128xf32> to vector<16x128xf32>
    %88 = arith.mulf %85, %87 : vector<16x128xf32>
    %c0_37 = arith.constant 0 : index
    %c0_38 = arith.constant 0 : index
    %89 = vector.load %arg11[%c0_37, %c0_38] : memref<1x128xf32, #tpu.memory_space<vmem>>, vector<1x128xf32>
    %90 = vector.broadcast %89 : vector<1x128xf32> to vector<16x128xf32>
    %91 = arith.addf %88, %90 : vector<16x128xf32>
    %c0_39 = arith.constant 0 : index
    %c0_40 = arith.constant 0 : index
    %92 = vector.load %arg12[%c0_39, %c0_40] : memref<128x1024xf32, #tpu.memory_space<vmem>>, vector<128x1024xf32>
    %cst_41 = arith.constant dense<0.000000e+00> : vector<16x1024xf32>
    %93 = tpu.matmul %91, %92, %cst_41 {dimension_numbers = #tpu.dot_dimension_numbers<[1], [0], [0], [1], [0, 0, 1, 1], [], []>} : vector<16x128xf32>, vector<128x1024xf32>, vector<16x1024xf32> -> vector<16x1024xf32>
    %c0_42 = arith.constant 0 : index
    %c0_43 = arith.constant 0 : index
    %94 = vector.load %arg13[%c0_42, %c0_43] : memref<1x1024xf32, #tpu.memory_space<vmem>>, vector<1x1024xf32>
    %95 = vector.broadcast %94 : vector<1x1024xf32> to vector<16x1024xf32>
    %96 = arith.addf %93, %95 : vector<16x1024xf32>
    %97 = vector.extract_strided_slice %96 {offsets = [0, 0], sizes = [16, 512], strides = [1, 1]} : vector<16x1024xf32> to vector<16x512xf32>
    %98 = vector.extract_strided_slice %96 {offsets = [0, 512], sizes = [16, 512], strides = [1, 1]} : vector<16x1024xf32> to vector<16x512xf32>
    %cst_44 = arith.constant 5.000000e-01 : f32
    %99 = vector.broadcast %cst_44 : f32 to vector<16x512xf32>
    %100 = arith.mulf %99, %98 : vector<16x512xf32>
    %cst_45 = arith.constant 0.707106769 : f32
    %101 = vector.broadcast %cst_45 : f32 to vector<16x512xf32>
    %102 = arith.mulf %98, %101 : vector<16x512xf32>
    %103 = math.erf %102 : vector<16x512xf32>
    %cst_46 = arith.constant 1.000000e+00 : f32
    %104 = vector.broadcast %cst_46 : f32 to vector<16x512xf32>
    %105 = arith.addf %104, %103 : vector<16x512xf32>
    %106 = arith.mulf %100, %105 : vector<16x512xf32>
    %107 = arith.mulf %97, %106 : vector<16x512xf32>
    %c0_47 = arith.constant 0 : index
    %c0_48 = arith.constant 0 : index
    %108 = vector.load %arg14[%c0_47, %c0_48] : memref<512x128xf32, #tpu.memory_space<vmem>>, vector<512x128xf32>
    %cst_49 = arith.constant dense<0.000000e+00> : vector<16x128xf32>
    %109 = tpu.matmul %107, %108, %cst_49 {dimension_numbers = #tpu.dot_dimension_numbers<[1], [0], [0], [1], [0, 0, 1, 1], [], []>} : vector<16x512xf32>, vector<512x128xf32>, vector<16x128xf32> -> vector<16x128xf32>
    %c0_50 = arith.constant 0 : index
    %c0_51 = arith.constant 0 : index
    %110 = vector.load %arg15[%c0_50, %c0_51] : memref<1x128xf32, #tpu.memory_space<vmem>>, vector<1x128xf32>
    %111 = vector.broadcast %110 : vector<1x128xf32> to vector<16x128xf32>
    %112 = arith.addf %109, %111 : vector<16x128xf32>
    %113 = arith.addf %67, %112 : vector<16x128xf32>
    %c0_52 = arith.constant 0 : index
    %c0_53 = arith.constant 0 : index
    %c0_54 = arith.constant 0 : index
    %114 = vector.load %arg16[%c0_52, %c0_53, %c0_54] : memref<1x16x128xf32, #tpu.memory_space<vmem>>, vector<1x16x128xf32>
    %115 = vector.shape_cast %114 : vector<1x16x128xf32> to vector<16x128xf32>
    %116 = vector.shape_cast %113 : vector<16x128xf32> to vector<1x16x128xf32>
    tpu.vector_store %arg16[%c0_52, %c0_53, %c0_54], %116 {strides = array<i32>} : memref<1x16x128xf32, #tpu.memory_space<vmem>>, vector<1x16x128xf32>,
    return
  }
  func.func @transform_0(%arg0: i32, %arg1: i32) -> (i32, i32, i32) {
    %c0_i32 = arith.constant 0 : i32
    %c0_i32_0 = arith.constant 0 : i32
    return %arg0, %arg1, %c0_i32 : i32, i32, i32
  }
  func.func @transform_1(%arg0: i32, %arg1: i32) -> (i32, i32, i32, i32) {
    %c0_i32 = arith.constant 0 : i32
    %c0_i32_0 = arith.constant 0 : i32
    %c0_i32_1 = arith.constant 0 : i32
    %c0_i32_2 = arith.constant 0 : i32
    return %arg0, %c0_i32, %c0_i32_0, %c0_i32_1 : i32, i32, i32, i32
  }
  func.func @transform_2(%arg0: i32, %arg1: i32) -> (i32, i32, i32, i32) {
    %c0_i32 = arith.constant 0 : i32
    %c0_i32_0 = arith.constant 0 : i32
    %c0_i32_1 = arith.constant 0 : i32
    %c0_i32_2 = arith.constant 0 : i32
    return %arg0, %c0_i32, %c0_i32_0, %c0_i32_1 : i32, i32, i32, i32
  }
  func.func @transform_3(%arg0: i32, %arg1: i32) -> (i32, i32) {
    %c0_i32 = arith.constant 0 : i32
    %c0_i32_0 = arith.constant 0 : i32
    %c0_i32_1 = arith.constant 0 : i32
    return %c0_i32, %c0_i32_0 : i32, i32
  }
  func.func @transform_4(%arg0: i32, %arg1: i32) -> (i32, i32) {
    %c0_i32 = arith.constant 0 : i32
    %c0_i32_0 = arith.constant 0 : i32
    %c0_i32_1 = arith.constant 0 : i32
    return %c0_i32, %c0_i32_0 : i32, i32
  }
  func.func @transform_5(%arg0: i32, %arg1: i32) -> (i32, i32) {
    %c0_i32 = arith.constant 0 : i32
    %c0_i32_0 = arith.constant 0 : i32
    %c0_i32_1 = arith.constant 0 : i32
    return %c0_i32, %c0_i32_0 : i32, i32
  }
  func.func @transform_6(%arg0: i32, %arg1: i32) -> (i32, i32) {
    %c0_i32 = arith.constant 0 : i32
    %c0_i32_0 = arith.constant 0 : i32
    %c0_i32_1 = arith.constant 0 : i32
    return %c0_i32, %c0_i32_0 : i32, i32
  }
  func.func @transform_7(%arg0: i32, %arg1: i32) -> (i32, i32) {
    %c0_i32 = arith.constant 0 : i32
    %c0_i32_0 = arith.constant 0 : i32
    %c0_i32_1 = arith.constant 0 : i32
    return %c0_i32, %c0_i32_0 : i32, i32
  }
  func.func @transform_8(%arg0: i32, %arg1: i32) -> (i32, i32) {
    %c0_i32 = arith.constant 0 : i32
    %c0_i32_0 = arith.constant 0 : i32
    %c0_i32_1 = arith.constant 0 : i32
    return %c0_i32, %c0_i32_0 : i32, i32
  }
  func.func @transform_9(%arg0: i32, %arg1: i32) -> (i32, i32) {
    %c0_i32 = arith.constant 0 : i32
    %c0_i32_0 = arith.constant 0 : i32
    %c0_i32_1 = arith.constant 0 : i32
    return %c0_i32, %c0_i32_0 : i32, i32
  }
  func.func @transform_10(%arg0: i32, %arg1: i32) -> (i32, i32) {
    %c0_i32 = arith.constant 0 : i32
    %c0_i32_0 = arith.constant 0 : i32
    %c0_i32_1 = arith.constant 0 : i32
    return %c0_i32, %c0_i32_0 : i32, i32
  }
  func.func @transform_11(%arg0: i32, %arg1: i32) -> (i32, i32) {
    %c0_i32 = arith.constant 0 : i32
    %c0_i32_0 = arith.constant 0 : i32
    %c0_i32_1 = arith.constant 0 : i32
    return %c0_i32, %c0_i32_0 : i32, i32
  }
  func.func @transform_12(%arg0: i32, %arg1: i32) -> (i32, i32) {
    %c0_i32 = arith.constant 0 : i32
    %c0_i32_0 = arith.constant 0 : i32
    %c0_i32_1 = arith.constant 0 : i32
    return %c0_i32, %c0_i32_0 : i32, i32
  }
  func.func @transform_13(%arg0: i32, %arg1: i32) -> (i32, i32) {
    %c0_i32 = arith.constant 0 : i32
    %c0_i32_0 = arith.constant 0 : i32
    %c0_i32_1 = arith.constant 0 : i32
    return %c0_i32, %c0_i32_0 : i32, i32
  }
  func.func @transform_14(%arg0: i32, %arg1: i32) -> (i32, i32, i32) {
    %c0_i32 = arith.constant 0 : i32
    %c0_i32_0 = arith.constant 0 : i32
    return %arg0, %arg1, %c0_i32 : i32, i32, i32
  }
}

</mosaic_0001>

<bundles_post_ra>
// kernel: tpu_custom_call.1
= control target key start
LH: loop header
LB: loop body
LE: loop exit
PB: predicated region body
PF: predicated region fallthrough
CT: control target
= control target key end

     0   :  { %s4657_s0 = inlined_call_operand.hbm [shape: f32[2,16,128], index: 0, kind: input, shape index: {}]   ;;  %s4658_s1 = inlined_call_operand.hbm [shape: f32[2,4,32,32], index: 1, kind: input, shape index: {}]   ;;  %s4659_s2 = inlined_call_operand.hbm [shape: f32[2,4,32,32], index: 2, kind: input, shape index: {}]   ;;  %s4660_s3 = inlined_call_operand.vmem [shape: f32[1,128], index: 3, kind: input, shape index: {}]   ;;  %s4661_s4 = inlined_call_operand.vmem [shape: f32[1,128], index: 4, kind: input, shape index: {}]   ;;  %s4662_s5 = inlined_call_operand.hbm [shape: f32[128,128], index: 5, kind: input, shape index: {}]   ;;  %s4663_s6 = inlined_call_operand.hbm [shape: f32[128,128], index: 6, kind: input, shape index: {}]   ;;  %s4664_s7 = inlined_call_operand.vmem [shape: f32[1,128], index: 7, kind: input, shape index: {}]   ;;  %s4665_s8 = inlined_call_operand.vmem [shape: f32[1,128], index: 8, kind: input, shape index: {}]   ;;  %s4666_s9 = inlined_call_operand.vmem [shape: f32[1,128], index: 9, kind: input, shape index: {}]   ;;  %s4667_s10 = inlined_call_operand.hbm [shape: f32[128,1024], index: 10, kind: input, shape index: {}]   ;;  %s4668_s11 = inlined_call_operand.vmem [shape: f32[1,1024], index: 11, kind: input, shape index: {}]   ;;  %s4669_s12 = inlined_call_operand.hbm [shape: f32[512,128], index: 12, kind: input, shape index: {}]   ;;  %s4670_s13 = inlined_call_operand.vmem [shape: f32[1,128], index: 13, kind: input, shape index: {}]   ;;  %s4671_s14 = inlined_call_operand.hbm [shape: f32[2,16,128], index: 14, kind: output, shape index: {}]  }
   0x1   :  { %4703 = sst [smem:[#allocation30_spill]] %s4658_s1 }
   0x2   :  { %4704 = sst [smem:[#allocation31_spill]] %s4660_s3 }
   0x3   :  { %4705 = sst [smem:[#allocation32_spill]] %s4661_s4 }
   0x4   :  { %4706 = sst [smem:[#allocation33_spill]] %s4662_s5 }
   0x5   :  { %4707 = sst [smem:[#allocation34_spill]] %s4664_s7 }
   0x6   :  { %4708 = sst [smem:[#allocation35_spill]] %s4665_s8 }
   0x7   :  { %4709 = sst [smem:[#allocation36_spill]] %s4666_s9 }
   0x8   :  { %4710 = sst [smem:[#allocation37_spill]] %s4667_s10 }
   0x9   :  { %4711 = sst [smem:[#allocation38_spill]] %s4668_s11 }
   0xa   :  { %4712 = sst [smem:[#allocation39_spill]] %s4670_s13 }
   0xb   :  { %4713 = sst [smem:[#allocation40_spill]] %s4671_s14 }
   0xc   :  { %19 = vsyncpa [#allocation3], 0 }
   0xd   :  { %21 = vsyncpa [#allocation3 + $0x1], 0 }
   0xe   :  { %22 = vsyncpa [#allocation6], 0 }
   0xf   :  { %24 = vsyncpa [#allocation6 + $0x1], 0 }
  0x10   :  { %25 = vsyncpa [#allocation9], 0 }
  0x11   :  { %26 = vsyncpa [#allocation12], 0 }
  0x12   :  { %27 = vsyncpa [#allocation4], 0 }
  0x13   :  { %29 = vsyncpa [#allocation4 + $0x1], 0  ;;  %s4017_s29 = smov 0   ;;  %s4019_s30 = smov 0  }
  0x14   :  { %s4021_s15 = smov 0   ;;  %s4023_s16 = smov 0  }
  0x15   :  { %s4025_s17 = smov 0   ;;  %s4027_s18 = smov 0  }
  0x16 LB: > { %4714 = sst [smem:[#allocation20_spill]] %s3902_s29  ;;  %s4048_s19 = sadd.s32 4294967295, %s3922_s18   ;;  %s3922_s18 = sphi %s4027_s18, %s35_s18   ;;  %s3918_s17 = sphi %s4025_s17, %s4776_s17   ;;  %s3914_s16 = sphi %s4023_s16, %s4775_s16   ;;  %s3910_s15 = sphi %s4021_s15, %s4771_s15   ;;  %s3906_s30 = sphi %s4019_s30, %s4774_s30   ;;  %s3902_s29 = sphi %s4017_s29, %s4773_s29  }
  0x17   : > { %4715 = sst [smem:[#allocation21_spill]] %s3910_s15  ;;  %s2706_s20 = sadd.s32 4294967294, %s3922_s18  }
  0x18   : > { %4716 = sst [smem:[#allocation22_spill]] %s3914_s16  ;;  %p69_p0 = scmp.ne.s32.totalorder %s3906_s30, %s3902_s29 }
  0x19   : > { %4717 = sst [smem:[#allocation23_spill]] %s3922_s18  ;;  %p4675_p1 = scmp.eq.s32.totalorder %s4048_s19, 0 }
  0x1a   : > { %4718 = sst [smem:[#allocation24_spill]] %s4048_s19  ;;  %p384_p3 = scmp.eq.s32.totalorder %s2706_s20, 1 }
  0x1b   : > { %p4057_p4 = por %p4675_p1, %p69_p0  ;;  %p2707_p5 = scmp.ge.s32.totalorder %s3922_s18, 1 }
  0x1c   : > { %p4062_p6 = por %p384_p3, %p69_p0  ;;  %p391_p7 = scmp.lt.s32.totalorder %s3922_s18, 3 }
  0x1d   : > { %s4719_s21 = scalar_select %p4057_p4, 1, 0 }
  0x1e   : > { %s4721_s22 = scalar_select %p4062_p6, 1, 0 }
  0x1f   : > { %4720 = sst [smem:[#allocation25_spill]] %s4719_s21  ;;  %p4067_p8 = pnand %p2707_p5, %p391_p7 }
  0x20   : > { %4722 = sst [smem:[#allocation26_spill]] %s4721_s22  ;;  %s3924_s24 = smov [#allocation8]  }
  0x21   : > { %s4723_s23 = scalar_select %p4067_p8, 1, 0 }
  0x22   : > { %s409_s25 = sshll.u32 %s3924_s24, 4  ;;  %p3456_p9 = pneg %p4067_p8  ;;  %s4071_s25 = int_to_ptr.vmem [resolvable:$true] %s409_s25 }
  0x23   : > { %s3925_s27 = smov [#allocation11]   ;;  %s4725_s5 = sld [smem:[#allocation33_spill]] }
  0x24   : > { %p4078_p11 = pnand %p3456_p9, %p4675_p1  ;;  %s444_s28 = sshll.u32 %s3925_s27, 4  ;;  %s4082_s28 = int_to_ptr.vmem [resolvable:$true] %s444_s28 }
  0x26   : > { %s4724_s26 = scalar_select %p4078_p11, 1, 0 }
  0x27   : > { %p4092_p13 = pneg %p4078_p11 }
  0x29   : > { %s3626_s29 = scalar_lea.hbm %s4725_s5, 2048 }
  0x2a   : > { %p3627_p12 = scmp.ne.s32.totalorder %s4725_s5, %s3626_s29  ;;  %p3633_p5 = scmp.lt.u32.totalorder %s3626_s29, %s4725_s5 }
  0x2b   : > { %s4726_s16 = scalar_select %p4092_p13, 1, 0 }
  0x2c   : > { %p3629_p0 = pnand %p4092_p13, %p3627_p12 }
  0x2e   : > { %p3630_p3 = pneg %p3629_p0 }
  0x30   : > { %p3635_p7 = pnand %p3633_p5, %p3630_p3 }
  0x32   : > { %3638 = shalt.err (!%p3635_p7)
}
  0x33   : > { %s3639_s14 = scalar_lea.vmem %s4071_s25, 2048  ;;  %p3647_p2 = scmp.lt.s32.totalorder %s4071_s25, %s4071_s25 }
  0x34   : > { %p3640_p9 = scmp.ne.s32.totalorder %s4071_s25, %s3639_s14  ;;  %p3648_p6 = scmp.lt.s32.totalorder %s3639_s14, %s3639_s14 }
  0x36   : > { %p3642_p10 = pnand %p3640_p9, %p4092_p13  ;;  %p3649_p12 = por %p3648_p6, %p3647_p2 }
  0x38   : > { %p3643_p1 = pneg %p3642_p10 }
  0x3a   : > { %p3650_p0 = pnand %p3649_p12, %p3643_p1 }
  0x3c   : > { %3653 = shalt.err (!%p3650_p0)
}
  0x3d   : > { %s4676_s22 = smov 128   ;;  %s4678_s13 = smov 8  }
  0x3e   : > { %3459 = dma.hbm_to_vmem [thread:$0]  (!%p4078_p11), %s4725_s5, 2048, %s4071_s25, [#allocation9], %s4676_s22, %s4676_s22, %s4678_s13  }
  0x3f   : > { %s4727_s10 = sld [smem:[#allocation37_spill]] }
  0x45   : > { %s3654_s14 = scalar_lea.hbm %s4727_s10, 16384 }
  0x46   : > { %p3655_p1 = scmp.ne.s32.totalorder %s4727_s10, %s3654_s14  ;;  %p3661_p10 = scmp.lt.u32.totalorder %s3654_s14, %s4727_s10 }
  0x48   : > { %p3657_p2 = pnand %p3655_p1, %p4092_p13 }
  0x4a   : > { %p3658_p6 = pneg %p3657_p2 }
  0x4c   : > { %p3663_p3 = pnand %p3661_p10, %p3658_p6 }
  0x4e   : > { %3666 = shalt.err (!%p3663_p3)
}
  0x4f   : > { %s3667_s25 = scalar_lea.vmem %s4082_s28, 16384  ;;  %p3675_p12 = scmp.lt.s32.totalorder %s4082_s28, %s4082_s28 }
  0x50   : > { %p3668_p5 = scmp.ne.s32.totalorder %s4082_s28, %s3667_s25  ;;  %p3676_p0 = scmp.lt.s32.totalorder %s3667_s25, %s3667_s25 }
  0x52   : > { %p3670_p7 = pnand %p3668_p5, %p4092_p13  ;;  %p3677_p1 = por %p3676_p0, %p3675_p12 }
  0x54   : > { %p3671_p9 = pneg %p3670_p7 }
  0x56   : > { %p3678_p2 = pnand %p3677_p1, %p3671_p9 }
  0x58   : > { %3681 = shalt.err (!%p3678_p2)
}
  0x59   : > { %s3928_s9 = smov 1024   ;;  %s3929_s7 = smov 64  }
  0x5a   : > { %3465 = dma.hbm_to_vmem [thread:$0]  (!%p4078_p11), %s4727_s10, 16384, %s4082_s28, [#allocation12], %s3928_s9, %s3928_s9, %s3929_s7  }
  0x5b   : > { %s47_s29 = sadd.s32 1, %s3918_s17  ;;  %s56_s20 = sadd.s32 1, %s3910_s15 }
  0x5c   : > { %p49_p6 = scmp.ge.s32.totalorder %s47_s29, 2  ;;  %p63_p10 = scmp.ne.s32.totalorder %s3910_s15, %s3906_s30 }
  0x5d   : > { %p64_p3 = scmp.eq.s32.totalorder %s3922_s18, 0  ;;  %p3487_p5 = scmp.lt.s32.totalorder %s3922_s18, 2 }
  0x5e   : > { %s4778_s29 = smov (%p49_p6, %s47_s29), 0  ;;  %p4729_p9 = scmp.eq.s32.totalorder %s4048_s19, 1 }
  0x5f   : > { %4728 = sst [smem:[#allocation27_spill]] %s4778_s29  ;;  %p65_p7 = por %p64_p3, %p63_p10 }
  0x60   : > { %p4149_p12 = por %p4729_p9, %p63_p10  ;;  %s51_s27 = ssub.s32 %s3918_s17, %s4778_s29 }
  0x61   : > { %s4156_s28 = sand.u32 1, %s3910_s15   ;;  %p54_p0 = scmp.eq.s32.totalorder %s51_s27, 0 }
  0x62   : > { %s4730_s24 = scalar_select %p4149_p12, 1, 0 }
  0x63   : > { %p4158_p1 = pnand %p3487_p5, %p65_p7  ;;  %s500_s25 = sand.u32 1, %s3922_s18  }
  0x64   : > { %4731 = sst [smem:[#allocation28_spill]] %s4730_s24  ;;  %s4681_s9 = sshll.u32 %s4156_s28, 7 }
  0x65   : > { %s4732_s14 = scalar_select %p4158_p1, 1, 0 }
  0x66   : > { %s4165_s7 = scalar_select %p54_p0, %s3910_s15, %s56_s20  }
  0x67   : > { %s4682_s8 = sshll.u32 %s3918_s17, 11  ;;  %s4734_s1 = sld [smem:[#allocation30_spill]] }
  0x68   : > { %4733 = sst [smem:[#allocation29_spill]] %s4165_s7  ;;  %s504_s27 = scalar_lea.vmem [#allocation5], %s4681_s9 }
  0x69   : > { %s511_s5 = sshll.u32 %s504_s27, 4  ;;  %s4179_s10 = scalar_lea.sflag [#allocation6], %s500_s25  ;;  %s4177_s5 = int_to_ptr.vmem [resolvable:$true] %s511_s5 }
  0x6a   : > { %p4185_p6 = pneg %p4158_p1 }
  0x6c   : > { %s4735_s29 = scalar_select %p4185_p6, 1, 0 }
  0x6d   : > { %s4173_s13 = scalar_lea.hbm %s4734_s1, %s4682_s8  ;;  %s3687_s9 = scalar_lea.hbm %s4734_s1, 4096 }
  0x6e   : > { %s3682_s20 = scalar_lea.hbm %s4173_s13, 2048  ;;  %p3688_p5 = scmp.lt.u32.totalorder %s4173_s13, %s4734_s1 }
  0x6f   : > { %p3683_p2 = scmp.ne.s32.totalorder %s4173_s13, %s3682_s20  ;;  %p3689_p7 = scmp.lt.u32.totalorder %s3687_s9, %s3682_s20 }
  0x70   : > { %p3691_p0 = scmp.lt.u32.totalorder %s3682_s20, %s4173_s13 }
  0x71   : > { %p3685_p10 = pnand %p4185_p6, %p3683_p2  ;;  %p3690_p9 = por %p3689_p7, %p3688_p5 }
  0x73   : > { %p3686_p3 = pneg %p3685_p10  ;;  %p3692_p12 = por %p3691_p0, %p3690_p9 }
  0x75   : > { %p3693_p4 = pnand %p3692_p12, %p3686_p3 }
  0x77   : > { %3696 = shalt.err (!%p3693_p4)
}
  0x78   : > { %s3697_s25 = scalar_lea.vmem %s4177_s5, 2048  ;;  %s3930_s22 = smov [#allocation5]  }
  0x79   : > { %p3698_p2 = scmp.ne.s32.totalorder %s4177_s5, %s3697_s25  ;;  %s3702_s11 = sshll.u32 %s3930_s22, 4  ;;  %s3703_s11 = int_to_ptr.vmem [resolvable:$false] %s3702_s11 }
  0x7a   : > { %s3704_s8 = scalar_lea.vmem %s3703_s11, 4096  ;;  %p3705_p11 = scmp.lt.s32.totalorder %s4177_s5, %s3703_s11 }
  0x7b   : > { %p3700_p10 = pnand %p3698_p2, %p4185_p6  ;;  %p3706_p13 = scmp.lt.s32.totalorder %s3704_s8, %s3697_s25 }
  0x7d   : > { %p3701_p8 = pneg %p3700_p10  ;;  %p3707_p5 = por %p3706_p13, %p3705_p11 }
  0x7f   : > { %p3708_p7 = pnand %p3707_p5, %p3701_p8 }
  0x81   : > { %3711 = shalt.err (!%p3708_p7)
}
  0x82   : > { %s4736_s9 = smov 8   ;;  %s4737_s20 = smov 128  }
  0x83   : > { %3475 = dma.hbm_to_vmem [thread:$0]  (!%p4158_p1), %s4173_s13, 2048, %s4177_s5, %s4179_s10, %s4737_s20, %s4737_s20, %s4736_s9  }
  0x84   : > { %s4738_s27 = sshll.u32 %s3918_s17, 11  ;;  %s4739_s11 = sshll.u32 %s4156_s28, 7 }
  0x85   : > { %s4217_s25 = scalar_lea.hbm %s4659_s2, %s4738_s27  ;;  %s4221_s8 = scalar_lea.vmem [#allocation7], %s4739_s11 }
  0x86   : > { %s532_s7 = sshll.u32 %s4221_s8, 4  ;;  %s3931_s15 = smov [#allocation10]   ;;  %s4275_s7 = int_to_ptr.vmem [resolvable:$true] %s532_s7 }
  0x87   : > { %s422_s18 = sshll.u32 %s3931_s15, 4  ;;  %s3932_s24 = smov [#allocation13]   ;;  %s423_s18 = int_to_ptr.vmem [resolvable:$true] %s422_s18 }
  0x88   : > { %s460_s4 = sshll.u32 %s3932_s24, 4  ;;  %s3712_s5 = scalar_lea.hbm %s4663_s6, 2048  ;;  %s461_s4 = int_to_ptr.vmem [resolvable:$true] %s460_s4 }
  0x89   : > { %p3713_p4 = scmp.ne.s32.totalorder %s4663_s6, %s3712_s5  ;;  %p4740_p8 = scmp.ne.s32.totalorder %s4726_s16, 0 }
  0x8a   : > { %p3719_p12 = scmp.lt.u32.totalorder %s3712_s5, %s4663_s6 }
  0x8b   : > { %p3715_p11 = pnand %p3713_p4, %p4740_p8 }
  0x8d   : > { %p3716_p13 = pneg %p3715_p11 }
  0x8f   : > { %p3721_p3 = pnand %p3719_p12, %p3716_p13 }
  0x91   : > { %3724 = shalt.err (!%p3721_p3)
}
  0x92   : > { %s3725_s15 = scalar_lea.vmem %s423_s18, 2048  ;;  %p3733_p10 = scmp.lt.s32.totalorder %s423_s18, %s423_s18 }
  0x93   : > { %p3726_p9 = scmp.ne.s32.totalorder %s423_s18, %s3725_s15  ;;  %p3734_p5 = scmp.lt.s32.totalorder %s3725_s15, %s3725_s15 }
  0x95   : > { %p3728_p0 = pnand %p3726_p9, %p4740_p8  ;;  %p3735_p7 = por %p3734_p5, %p3733_p10 }
  0x97   : > { %p3729_p2 = pneg %p3728_p0 }
  0x99   : > { %p3736_p1 = pnand %p3735_p7, %p3729_p2 }
  0x9b   : > { %3739 = shalt.err (!%p3736_p1)
}
  0x9c   : > { %p4741_p4 = scmp.ne.s32.totalorder %s4724_s26, 0  ;;  %s3740_s22 = scalar_lea.hbm %s4669_s12, 8192 }
  0x9d   : > { %p3741_p11 = scmp.ne.s32.totalorder %s4669_s12, %s3740_s22  ;;  %p3747_p12 = scmp.lt.u32.totalorder %s3740_s22, %s4669_s12 }
  0x9e   : > { %3462 = dma.hbm_to_vmem [thread:$0]  (!%p4741_p4), %s4663_s6, 2048, %s423_s18, [#allocation9], %s4737_s20, %s4737_s20, %s4736_s9  }
  0x9f   : > { %p3743_p1 = pnand %p3741_p11, %p4740_p8 }
  0xa1   : > { %p3744_p13 = pneg %p3743_p1 }
  0xa3   : > { %p3749_p3 = pnand %p3747_p12, %p3744_p13 }
  0xa5   : > { %3752 = shalt.err (!%p3749_p3)
}
  0xa6   : > { %s3753_s27 = scalar_lea.vmem %s461_s4, 8192  ;;  %p3761_p10 = scmp.lt.s32.totalorder %s461_s4, %s461_s4 }
  0xa7   : > { %p3754_p9 = scmp.ne.s32.totalorder %s461_s4, %s3753_s27  ;;  %p3762_p5 = scmp.lt.s32.totalorder %s3753_s27, %s3753_s27 }
  0xa9   : > { %p3756_p0 = pnand %p3754_p9, %p4740_p8  ;;  %p3763_p7 = por %p3762_p5, %p3761_p10 }
  0xab   : > { %p3757_p2 = pneg %p3756_p0 }
  0xad   : > { %p3764_p6 = pnand %p3763_p7, %p3757_p2 }
  0xaf   : > { %3767 = shalt.err (!%p3764_p6)
}
  0xb0   : > { %3468 = dma.hbm_to_vmem [thread:$0]  (!%p4741_p4), %s4669_s12, 8192, %s461_s4, [#allocation12], %s4737_s20, %s4737_s20, %s4736_s9  }
  0xb1   : > { %s2713_s16 = sshll.u32 %s4156_s28, 4  ;;  %s2774_s3 = sshll.u32 %s3918_s17, 8 }
  0xb2   : > { %s4271_s24 = scalar_lea.hbm %s4657_s0, %s2774_s3  ;;  %s481_s26 = scalar_lea.vmem [#allocation2], %s2713_s16 }
  0xb3   : > { %s490_s22 = sshll.u32 %s481_s26, 4  ;;  %s478_s11 = scalar_lea.sflag [#allocation3], %s4156_s28  ;;  %s4277_s22 = int_to_ptr.vmem [resolvable:$true] %s490_s22 }
  0xb4   : > { %s3768_s4 = scalar_lea.hbm %s4271_s24, 256  ;;  %p4742_p8 = scmp.ne.s32.totalorder %s4735_s29, 0 }
  0xb5   : > { %p3769_p6 = scmp.ne.s32.totalorder %s4271_s24, %s3768_s4  ;;  %s3773_s8 = scalar_lea.hbm %s4657_s0, 512 }
  0xb6   : > { %p3774_p1 = scmp.lt.u32.totalorder %s4271_s24, %s4657_s0  ;;  %p3775_p13 = scmp.lt.u32.totalorder %s3773_s8, %s3768_s4 }
  0xb7   : > { %p3771_p4 = pnand %p3769_p6, %p4742_p8  ;;  %p3777_p3 = scmp.lt.u32.totalorder %s3768_s4, %s4271_s24 }
  0xb8   : > { %p3776_p12 = por %p3775_p13, %p3774_p1 }
  0xb9   : > { %p3772_p11 = pneg %p3771_p4 }
  0xba   : > { %p3778_p9 = por %p3777_p3, %p3776_p12 }
  0xbc   : > { %p3779_p0 = pnand %p3778_p9, %p3772_p11 }
  0xbe   : > { %3782 = shalt.err (!%p3779_p0)
}
  0xbf   : > { %s3783_s18 = scalar_lea.vmem %s4277_s22, 256  ;;  %s3933_s15 = smov [#allocation2]  }
  0xc0   : > { %p3784_p2 = scmp.ne.s32.totalorder %s4277_s22, %s3783_s18  ;;  %s3788_s16 = sshll.u32 %s3933_s15, 4  ;;  %s3789_s16 = int_to_ptr.vmem [resolvable:$false] %s3788_s16 }
  0xc1   : > { %s3790_s3 = scalar_lea.vmem %s3789_s16, 512  ;;  %p3791_p7 = scmp.lt.s32.totalorder %s4277_s22, %s3789_s16 }
  0xc2   : > { %p3786_p10 = pnand %p3784_p2, %p4742_p8  ;;  %p3792_p6 = scmp.lt.s32.totalorder %s3790_s3, %s3783_s18 }
  0xc4   : > { %p3787_p5 = pneg %p3786_p10  ;;  %p3793_p4 = por %p3792_p6, %p3791_p7 }
  0xc6   : > { %p3794_p1 = pnand %p3793_p4, %p3787_p5 }
  0xc8   : > { %3797 = shalt.err (!%p3794_p1)
}
  0xc9   : > { %p4743_p11 = scmp.ne.s32.totalorder %s4732_s14, 0  ;;  %s3798_s19 = scalar_lea.hbm %s4217_s25, 2048 }
  0xca   : > { %p3799_p13 = scmp.ne.s32.totalorder %s4217_s25, %s3798_s19  ;;  %s3803_s4 = scalar_lea.hbm %s4659_s2, 4096 }
  0xcb   : > { %3472 = dma.hbm_to_vmem [thread:$0]  (!%p4743_p11), %s4271_s24, 256, %s4277_s22, %s478_s11, %s4737_s20, %s4737_s20, %s4736_s9  }
  0xcc   : > { %p3801_p12 = pnand %p3799_p13, %p4742_p8  ;;  %p3804_p9 = scmp.lt.u32.totalorder %s4217_s25, %s4659_s2 }
  0xcd   : > { %p3805_p0 = scmp.lt.u32.totalorder %s3803_s4, %s3798_s19  ;;  %p3807_p10 = scmp.lt.u32.totalorder %s3798_s19, %s4217_s25 }
  0xce   : > { %p3802_p3 = pneg %p3801_p12 }
  0xcf   : > { %p3806_p2 = por %p3805_p0, %p3804_p9 }
  0xd1   : > { %p3808_p5 = por %p3807_p10, %p3806_p2 }
  0xd3   : > { %p3809_p7 = pnand %p3808_p5, %p3802_p3 }
  0xd5   : > { %3812 = shalt.err (!%p3809_p7)
}
  0xd6   : > { %s3813_s28 = scalar_lea.vmem %s4275_s7, 2048  ;;  %s3934_s24 = smov [#allocation7]  }
  0xd7   : > { %p3814_p6 = scmp.ne.s32.totalorder %s4275_s7, %s3813_s28  ;;  %s3818_s22 = sshll.u32 %s3934_s24, 4  ;;  %s3819_s22 = int_to_ptr.vmem [resolvable:$false] %s3818_s22 }
  0xd8   : > { %s3820_s11 = scalar_lea.vmem %s3819_s22, 4096  ;;  %p3821_p13 = scmp.lt.s32.totalorder %s4275_s7, %s3819_s22 }
  0xd9   : > { %p3816_p4 = pnand %p3814_p6, %p4742_p8  ;;  %p3822_p12 = scmp.lt.s32.totalorder %s3820_s11, %s3813_s28 }
  0xdb   : > { %p3817_p1 = pneg %p3816_p4  ;;  %p3823_p9 = por %p3822_p12, %p3821_p13 }
  0xdd   : > { %p3824_p0 = pnand %p3823_p9, %p3817_p1 }
  0xdf   : > { %3827 = shalt.err (!%p3824_p0)
}
  0xe0   : > { %3478 = dma.hbm_to_vmem [thread:$0]  (!%p4743_p11), %s4217_s25, 2048, %s4275_s7, %s4179_s10, %s4737_s20, %s4737_s20, %s4736_s9  }
  0xe1   : > { %p4744_p8 = scmp.ne.s32.totalorder %s4723_s23, 0 }
  0xe2   : > { %s4745_s29 = sld [smem:[#allocation25_spill]] (!%p4744_p8)  ;;  %s4334_s8 = sand.u32 (!%p4744_p8), 1, %s3906_s30  }
  0xe3   : > { %544 = sbr.rel (%p4744_p8) target bundleno = 2826 (0xb0a), region = 76  ;;  %s2723_s1 = sshll.u32 (!%p4744_p8), %s4334_s8, 4 }
  0xe4   : > { %s547_s27 = scalar_lea.sflag (!%p4744_p8), [#allocation3], %s4334_s8  ;;  %s550_s14 = scalar_lea.vmem (!%p4744_p8), [#allocation2], %s2723_s1 }
  0xe8   : > { %p4746_p3 = scmp.ne.s32.totalorder (!%p4744_p8), %s4745_s29, 0 }
  0xea   : > { %3881 = dma.done.wait (%p4746_p3), %s547_s27, 256  }
  0xeb   : > { %3883 = vsyncadd (%p4746_p3), %s547_s27, 4294967040  ;;  %s4747_s10 = sld [smem:[#allocation24_spill]]  ;;  %s2724_s7 = sshll.u32 %s4334_s8, 7 }
  0xec   : > { %s4346_s20 = scalar_lea.vmem [#allocation5], %s2724_s7 }
  0xf1   : > { %s555_s23 = sand.u32 1, %s4747_s10  }
  0xf2   : > { %s556_s9 = scalar_lea.sflag [#allocation6], %s555_s23 }
  0xf3   : > { %3885 = dma.done.wait (%p4746_p3), %s556_s9, 4096  }
  0xf4   : > { %3887 = vsyncadd (%p4746_p3), %s556_s9, 4294963200  ;;  %s4352_s25 = scalar_lea.vmem [#allocation7], %s2724_s7  ;;  %p4748_p11 = scmp.eq.s32.totalorder %s4747_s10, 0 }
  0xf6   : > { %3889 = dma.done.wait (%p4748_p11), [#allocation9], 4096   ;;  %p4749_p2 = pmov %p4748_p11 }
  0xf8   : > { %3891 = vsyncadd (%p4749_p2), [#allocation9], 4294963200  ;;  %p4750_p10 = pmov %p4749_p2 }
  0xf9   : > { %p4751_p5 = pmov %p4749_p2 }
  0xfa   : > { %3893 = dma.done.wait (%p4750_p10), [#allocation12], 24576  }
  0xfb   : > { %3895 = vsyncadd (%p4751_p5), [#allocation12], 4294942720  ;;  %v4362_v0 = vld [vmem:[%s550_s14] sm:$0xff]  ;;  %v4365_v1 = vld [vmem:[%s550_s14 + $0x8] sm:$0xff]  ;;  %vm821_vm0 = vcmask 261120   ;;  %s4754_s16 = sld [smem:[#allocation31_spill]] }
  0xfc   : > { %643 = vadd.xlane.f32.xlu0 %v4362_v0  ;;  %v684_v2 = vld [vmem:[#allocation8] sm:$0xff]  ;;  %v685_v3 = vld [vmem:[#allocation8 + $0x8] sm:$0xff]  ;;  %v686_v4 = vld [vmem:[#allocation8 + $0x10] sm:$0xff]  ;;  %s4755_s21 = sld [smem:[#allocation32_spill]]  ;;  %s3935_s26 = smov 96   ;;  %vm1624_vm2 = vcmask 523264  }
  0xfd   : > { %v3096_v5 = vpack.c.bf16 %v685_v3, %v684_v2  ;;  %v687_v6 = vld [vmem:[#allocation8 + $0x18] sm:$0xff]  ;;  %v688_v16 = vld [vmem:[#allocation8 + $0x20] sm:$0xff]  ;;  %v689_v17 = vld [vmem:[#allocation8 + $0x28] sm:$0xff]  ;;  %s3936_s4 = smov 64   ;;  %s3937_s5 = smov 32   ;;  %vm1627_vm3 = vcmask 785408  }
  0xfe   : > { %v3100_v7 = vpack.c.bf16 %v687_v6, %v686_v4  ;;  %v3104_v18 = vpack.c.bf16 %v689_v17, %v688_v16  ;;  %v690_v19 = vld [vmem:[#allocation8 + $0x30] sm:$0xff]  ;;  %v691_v20 = vld [vmem:[#allocation8 + $0x38] sm:$0xff]  ;;  %v692_v22 = vld [vmem:[#allocation8 + $0x40] sm:$0xff]  ;;  %s4756_s24 = sld [smem:[#allocation34_spill]]  ;;  %s4757_s29 = sld [smem:[#allocation35_spill]] }
  0xff   : > { %3097 = vmatprep.subr.bf16.mxu0 %v3096_v5  ;;  %v3108_v21 = vpack.c.bf16 %v691_v20, %v690_v19  ;;  %v693_v23 = vld [vmem:[#allocation8 + $0x48] sm:$0xff]  ;;  %v694_v25 = vld [vmem:[#allocation8 + $0x50] sm:$0xff]  ;;  %v695_v26 = vld [vmem:[#allocation8 + $0x58] sm:$0xff]  ;;  %s4758_s10 = sld [smem:[#allocation36_spill]]  ;;  %s4759_s9 = sld [smem:[#allocation38_spill]] }
 0x100   : > { %645 = vadd.xlane.f32.xlu0 %v4365_v1  ;;  %3099 = vmatpush3.bf16.msra.mxu0 %v3096_v5  ;;  %v3112_v24 = vpack.c.bf16 %v693_v23, %v692_v22  ;;  %v696_v27 = vld [vmem:[#allocation8 + $0x60] sm:$0xff]  ;;  %v3116_v28 = vpack.c.bf16 %v695_v26, %v694_v25  ;;  %v697_v29 = vld [vmem:[#allocation8 + $0x68] sm:$0xff]  ;;  %v698_v31 = vld [vmem:[#allocation8 + $0x70] sm:$0xff]  ;;  %s4760_s18 = sld [smem:[#allocation39_spill]]  ;;  %s4761_s15 = sld [smem:[#allocation22_spill]] }
 0x101   : > { %3101 = vmatprep.subr.bf16.mxu0 %v3100_v7  ;;  %v3120_v30 = vpack.c.bf16 %v697_v29, %v696_v27  ;;  %v699_v32 = vld [vmem:[#allocation8 + $0x78] sm:$0xff]  ;;  %v789_v34 = vld [vmem:[%s4346_s20] sm:$0xff]  ;;  %v790_v35 = vld [vmem:[%s4346_s20 + $0x8] sm:$0xff]  ;;  %s638_s3 = scalar_lea.vmem [#allocation14], %s2723_s1  ;;  %s2522_s1 = scalar_lea.sflag [#allocation4], %s4334_s8 }
 0x102   : > { %v3124_v33 = vpack.c.bf16 %v699_v32, %v698_v31  ;;  %v791_v36 = vld [vmem:[%s4346_s20 + $0x10] sm:$0xff]  ;;  %v3128_v37 = vpack.c.bf16 %v790_v35, %v789_v34  ;;  %vm4375_vm1 = vmpackc.low %vm821_vm0, %vm821_vm0  ;;  %v792_v39 = vld [vmem:[%s4346_s20 + $0x18] sm:$0xff]  ;;  %s2537_s19 = sshll.u32 %s638_s3, 4  ;;  %s4602_s19 = int_to_ptr.vmem [resolvable:$true] %s2537_s19 }
 0x103   : > { %v3134_v40 = vpack.c.bf16 %v792_v39, %v791_v36  ;;  %v2731_v48 = vld [vmem:[%s4754_s16] ss:$0 sm:$0xff]  ;;  %v794_v58 = vld [vmem:[%s4346_s20 + $0x28] sm:$0xff]  ;;  %v795_v60 = vld [vmem:[%s4346_s20 + $0x30] sm:$0xff]  ;;  %s4762_s16 = sld [smem:[#allocation28_spill]]  ;;  %s3828_s28 = scalar_lea.vmem %s4602_s19, 256 }
 0x104   : > { %3103 = vmatpush3.bf16.msra.mxu0 %v3100_v7  ;;  %3130 = vmatprep.subr.msk.bf16.mxu1 %vm4375_vm1, %v3128_v37  ;;  %v2732_v50 = vld [vmem:[%s4755_s21] ss:$0 sm:$0xff]  ;;  %v796_v61 = vld [vmem:[%s4346_s20 + $0x38] sm:$0xff]  ;;  %v798_v4 = vld [vmem:[%s4346_s20 + $0x48] sm:$0xff]  ;;  %p3829_p7 = scmp.ne.s32.totalorder %s4602_s19, %s3828_s28 }
 0x105   : > { %3105 = vmatprep.subr.bf16.mxu0 %v3104_v18  ;;  %3133 = vmatpush3.bf16.xpose.msk.msra.mxu1 %vm4375_vm1, %v3128_v37  ;;  %v793_v57 = vld [vmem:[%s4346_s20 + $0x20] sm:$0xff]  ;;  %v3146_v2 = vpack.c.bf16 %v796_v61, %v795_v60  ;;  %v799_v6 = vld [vmem:[%s4346_s20 + $0x50] sm:$0xff]  ;;  %v800_v7 = vld [vmem:[%s4346_s20 + $0x58] sm:$0xff] }
 0x106   : > { %3136 = vmatprep.subr.msk.bf16.mxu1 %vm4375_vm1, %v3134_v40  ;;  %v3140_v59 = vpack.c.bf16 %v794_v58, %v793_v57  ;;  %v797_v3 = vld [vmem:[%s4346_s20 + $0x40] sm:$0xff]  ;;  %v804_v16 = vld [vmem:[%s4346_s20 + $0x78] sm:$0xff]  ;;  %s2777_s21 = sshll.u32 %s4761_s15, 8 }
 0x107   : > { %v3152_v5 = vpack.c.bf16 %v798_v4, %v797_v3 }
 0x108   : > { %3107 = vmatpush3.bf16.msra.mxu0 %v3104_v18 }
 0x109   : > { %3109 = vmatprep.subr.bf16.mxu0 %v3108_v21  ;;  %p4764_p6 = scmp.ne.s32.totalorder %s4762_s16, 0 }
 0x10b   : > { %p3830_p4 = pnand %p3829_p7, %p4764_p6 }
 0x10c   : > { %3111 = vmatpush3.bf16.msra.mxu0 %v3108_v21 }
 0x10d   : > { %3113 = vmatprep.subr.bf16.mxu0 %v3112_v24  ;;  %3139 = vmatpush3.bf16.xpose.msk.msra.mxu1 %vm4375_vm1, %v3134_v40  ;;  %p3831_p1 = pneg %p3830_p4 }
 0x10e   : > { %3142 = vmatprep.subr.msk.bf16.mxu1 %vm4375_vm1, %v3140_v59 }
 0x110   : > { %3115 = vmatpush3.bf16.msra.mxu0 %v3112_v24 }
 0x111   : > { %3117 = vmatprep.subr.bf16.mxu0 %v3116_v28 }
 0x114   : > { %3119 = vmatpush3.bf16.msra.mxu0 %v3116_v28 }
 0x115   : > { %3121 = vmatprep.subr.bf16.mxu0 %v3120_v30 }
 0x118   : > { %3123 = vmatpush3.bf16.msra.mxu0 %v3120_v30 }
 0x119   : > { %3125 = vmatprep.subr.bf16.mxu0 %v3124_v33 }
 0x11c   : > { %3127 = vmatpush3.bf16.msra.mxu0 %v3124_v33 }
 0x189   : > { %v644_v8 = vpop.xlane.xlu0 %643 }
 0x18a   : > { %v648_v9 = vmul.f32 0.0078125, %v644_v8 }
 0x18c   : > { %v650_v10 = vsub.f32 %v4362_v0, %v648_v9 }
 0x18d   : > { %v646_v11 = vpop.xlane.xlu0 %645 }
 0x18e   : > { %v649_v12 = vmul.f32 0.0078125, %v646_v11  ;;  %v652_v13 = vmul.f32 %v650_v10, %v650_v10 }
 0x190   : > { %v651_v14 = vsub.f32 %v4365_v1, %v649_v12  ;;  %654 = vadd.xlane.f32.xlu1 %v652_v13  ;;  %v801_v12 = vld [vmem:[%s4346_s20 + $0x60] sm:$0xff]  ;;  %v802_v13 = vld [vmem:[%s4346_s20 + $0x68] sm:$0xff] }
 0x192   : > { %v653_v15 = vmul.f32 %v651_v14, %v651_v14 }
 0x194   : > { %656 = vadd.xlane.f32.xlu1 %v653_v15  ;;  %v803_v15 = vld [vmem:[%s4346_s20 + $0x70] sm:$0xff] }
 0x195   : > { %v3170_v17 = vpack.c.bf16 %v804_v16, %v803_v15 }
 0x21d   : > { %v655_v41 = vpop.xlane.xlu1 %654 }
 0x21e   : > { %v658_v42 = vmul.f32 0.0078125, %v655_v41 }
 0x220   : > { %v660_v43 = vadd.f32 1e-05, %v658_v42 }
 0x221   : > { %v657_v44 = vpop.xlane.xlu1 %656 }
 0x222   : > { %3570 = vrsqrt.f32 %v660_v43  ;;  %v659_v45 = vmul.f32 0.0078125, %v657_v44 }
 0x224   : > { %v661_v46 = vadd.f32 1e-05, %v659_v45 }
 0x226   : > { %3572 = vrsqrt.f32 %v661_v46 }
 0x22c   : > { %v3571_v47 = vpop.eup %3570 }
 0x22d   : > { %v664_v49 = vmul.f32 %v3571_v47, %v650_v10  ;;  %v3158_v10 = vpack.c.bf16 %v800_v7, %v799_v6  ;;  %v805_v47 = vld [vmem:[%s4352_s25] sm:$0xff] }
 0x22f   : > { %v673_v51 = vmul.f32 %v2731_v48, %v664_v49 }
 0x230   : > { %v3573_v52 = vpop.eup %3572 }
 0x231   : > { %v665_v53 = vmul.f32 %v3573_v52, %v651_v14  ;;  %v682_v54 = vadd.f32 %v2732_v50, %v673_v51  ;;  %v3164_v14 = vpack.c.bf16 %v802_v13, %v801_v12  ;;  %v808_v51 = vld [vmem:[%s4352_s25 + $0x18] sm:$0xff] }
 0x233   : > { %v674_v55 = vmul.f32 %v2731_v48, %v665_v53  ;;  %2970 = vmatprep.mubr.f32.mxu0 %v682_v54  ;;  %v806_v48 = vld [vmem:[%s4352_s25 + $0x8] sm:$0xff] }
 0x234   : > { %v3176_v49 = vpack.c.bf16 %v806_v48, %v805_v47 }
 0x235   : > { %v683_v56 = vadd.f32 %v2732_v50, %v674_v55  ;;  %v807_v50 = vld [vmem:[%s4352_s25 + $0x10] sm:$0xff] }
 0x236   : > { %3177 = vmatprep.subr.bf16.mxu0 %v3176_v49  ;;  %v3180_v52 = vpack.c.bf16 %v808_v51, %v807_v50 }
 0x237   : > { %2971 = vmatmul.mubr.f32.vlgmr.msra.gmra.mrb[0].mxu0 %v683_v56 }
 0x238   : > { %3179 = vmatpush3.bf16.msra.mxu0 %v3176_v49 }
 0x239   : > { %3181 = vmatprep.subr.bf16.mxu0 %v3180_v52 }
 0x23c   : > { %3183 = vmatpush3.bf16.msra.mxu0 %v3180_v52 }
 0x30a   : > { %v2972_v62 = vpop.f32.mrb[0].mxu0 }
 0x30b   : > { %779 = vrot.lane.b32.xlu1 %v2972_v62, %s3935_s26  ;;  %v766_v63 = vpop.f32.mrb[1].mxu0 }
 0x30c   : > { %777 = vrot.lane.b32.xlu0 %v766_v63, %s3935_s26  ;;  %2981 = vmatprep.mubr.msk.f32.mxu1 %vm821_vm0, %v766_v63 }
 0x30d   : > { %2982 = vmatmul.mubr.msk.f32.vlgmr.msra.gmra.mrb[0].mxu1 %vm821_vm0, %v2972_v62 }
 0x30e   : > { %3145 = vmatpush3.bf16.xpose.msk.msra.mxu1 %vm4375_vm1, %v3140_v59 }
 0x30f   : > { %781 = vrot.lane.b32.xlu1 %v766_v63, %s3936_s4  ;;  %3148 = vmatprep.subr.msk.bf16.mxu1 %vm4375_vm1, %v3146_v2 }
 0x310   : > { %785 = vrot.lane.b32.xlu0 %v766_v63, %s3937_s5 }
 0x313   : > { %783 = vrot.lane.b32.xlu1 %v2972_v62, %s3936_s4 }
 0x316   : > { %3151 = vmatpush3.bf16.xpose.msk.msra.mxu1 %vm4375_vm1, %v3146_v2 }
 0x317   : > { %787 = vrot.lane.b32.xlu1 %v2972_v62, %s3937_s5  ;;  %3154 = vmatprep.subr.msk.bf16.mxu1 %vm4375_vm1, %v3152_v5 }
 0x37d   : > { %v780_v8 = vpop.permute.xlu1 %779 }
 0x37e   : > { %v778_v9 = vpop.permute.xlu0 %777 }
 0x37f   : > { %2992 = vmatprep.mubr.msk.f32.mxu1 %vm821_vm0, %v778_v9 }
 0x380   : > { %2993 = vmatmul.mubr.msk.f32.vlgmr.msra.gmra.mrb[2].mxu1 %vm821_vm0, %v780_v8 }
 0x381   : > { %3157 = vmatpush3.bf16.xpose.msk.msra.mxu1 %vm4375_vm1, %v3152_v5  ;;  %v782_v11 = vpop.permute.xlu1 %781 }
 0x382   : > { %3003 = vmatprep.mubr.msk.f32.mxu1 %vm821_vm0, %v782_v11  ;;  %3160 = vmatprep.subr.msk.bf16.mxu1 %vm4375_vm1, %v3158_v10  ;;  %v786_v19 = vpop.permute.xlu0 %785 }
 0x385   : > { %v784_v18 = vpop.permute.xlu1 %783 }
 0x389   : > { %3163 = vmatpush3.bf16.xpose.msk.msra.mxu1 %vm4375_vm1, %v3158_v10  ;;  %v788_v20 = vpop.permute.xlu1 %787 }
 0x38a   : > { %3166 = vmatprep.subr.msk.bf16.mxu1 %vm4375_vm1, %v3164_v14 }
 0x390   : > { %3004 = vmatmul.mubr.msk.f32.vlgmr.msra.gmra.mrb[4].mxu1 %vm821_vm0, %v784_v18  ;;  %v810_v18 = vld [vmem:[%s4352_s25 + $0x28] sm:$0xff] }
 0x391   : > { %3169 = vmatpush3.bf16.xpose.msk.msra.mxu1 %vm4375_vm1, %v3164_v14  ;;  %3014 = vmatprep.mubr.msk.f32.mxu1 %vm821_vm0, %v786_v19 }
 0x392   : > { %3172 = vmatprep.subr.msk.bf16.mxu1 %vm4375_vm1, %v3170_v17 }
 0x399   : > { %3175 = vmatpush3.bf16.xpose.msk.msra.mxu1 %vm4375_vm1, %v3170_v17  ;;  %v809_v17 = vld [vmem:[%s4352_s25 + $0x20] sm:$0xff] }
 0x39a   : > { %v3184_v19 = vpack.c.bf16 %v810_v18, %v809_v17  ;;  %v1638_v18 = vld [vmem:[#allocation10 + $0x40] sm:$0xff] }
 0x39c   : > { %3185 = vmatprep.subr.bf16.mxu1 %v3184_v19 }
 0x3a0   : > { %3015 = vmatmul.mubr.msk.f32.vlgmr.msra.gmra.mrb[6].mxu1 %vm821_vm0, %v788_v20  ;;  %v811_v20 = vld [vmem:[%s4352_s25 + $0x30] sm:$0xff] }
 0x3a1   : > { %3187 = vmatpush3.bf16.msra.mxu1 %v3184_v19  ;;  %v1639_v19 = vld [vmem:[#allocation10 + $0x48] sm:$0xff] }
 0x3e0   : > { %v2983_v21 = vpop.f32.mrb[0].mxu1 }
 0x3e1   : > { %v904_v22 = vpop.f32.mrb[1].mxu1  ;;  %v1189_v23 = vsel %vm821_vm0, %v2983_v21, -inf }
 0x3e2   : > { %1190 = vmax.xlane.f32.xlu1 %v1189_v23  ;;  %v1186_v24 = vsel %vm821_vm0, %v904_v22, -inf }
 0x3e3   : > { %1187 = vmax.xlane.f32.xlu0 %v1186_v24 }
 0x453   : > { %v2994_v25 = vpop.f32.mrb[2].mxu1 }
 0x454   : > { %v995_v26 = vpop.f32.mrb[3].mxu1  ;;  %v1195_v27 = vsel %vm821_vm0, %v2994_v25, -inf }
 0x455   : > { %1196 = vmax.xlane.f32.xlu0 %v1195_v27  ;;  %v1192_v28 = vsel %vm821_vm0, %v995_v26, -inf }
 0x459   : > { %1193 = vmax.xlane.f32.xlu0 %v1192_v28 }
 0x463   : > { %v3005_v29 = vpop.f32.mrb[4].mxu1 }
 0x464   : > { %v1086_v30 = vpop.f32.mrb[5].mxu1  ;;  %v1201_v31 = vsel %vm821_vm0, %v3005_v29, -inf }
 0x465   : > { %1202 = vmax.xlane.f32.xlu1 %v1201_v31  ;;  %v1198_v32 = vsel %vm821_vm0, %v1086_v30, -inf }
 0x466   : > { %1199 = vmax.xlane.f32.xlu0 %v1198_v32 }
 0x46f   : > { %v1191_v33 = vpop.xlane.xlu1 %1190 }
 0x470   : > { %v1211_v34 = vsub.f32 %v2983_v21, %v1191_v33  ;;  %v1188_v35 = vpop.xlane.xlu0 %1187  ;;  %v812_v21 = vld [vmem:[%s4352_s25 + $0x38] sm:$0xff] }
 0x471   : > { %v1210_v36 = vsub.f32 %v904_v22, %v1188_v35  ;;  %v3188_v23 = vpack.c.bf16 %v812_v21, %v811_v20  ;;  %v816_v35 = vld [vmem:[%s4352_s25 + $0x58] sm:$0xff]  ;;  %v1640_v20 = vld [vmem:[#allocation10 + $0x50] sm:$0xff]  ;;  %v3224_v21 = vpack.c.bf16 %v1639_v19, %v1638_v18  ;;  %v1811_v18 = vld [vmem:[#allocation11 + $0x148] sm:$0xff] }
 0x472   : > { %v1220_v37 = vmul.f32 1.442695, %v1211_v34  ;;  %v815_v34 = vld [vmem:[%s4352_s25 + $0x50] sm:$0xff] }
 0x473   : > { %v1218_v38 = vmul.f32 1.442695, %v1210_v36  ;;  %v3016_v39 = vpop.f32.mrb[6].mxu1  ;;  %3189 = vmatprep.subr.bf16.mxu1 %v3188_v23 }
 0x474   : > { %3574 = vpow2.f32 %v1220_v37  ;;  %v1177_v40 = vpop.f32.mrb[7].mxu1  ;;  %v1207_v41 = vsel %vm821_vm0, %v3016_v39, -inf  ;;  %3191 = vmatpush3.bf16.msra.mxu1 %v3188_v23 }
 0x475   : > { %3576 = vpow2.f32 %v1218_v38  ;;  %1208 = vmax.xlane.f32.xlu1 %v1207_v41  ;;  %v1204_v42 = vsel %vm821_vm0, %v1177_v40, -inf  ;;  %v3196_v38 = vpack.c.bf16 %v816_v35, %v815_v34 }
 0x476   : > { %1205 = vmax.xlane.f32.xlu0 %v1204_v42 }
 0x47e   : > { %v4452_v43 = vpop.eup %3574 }
 0x47f   : > { %v4454_v44 = vpop.eup %3576  ;;  %v1237_v45 = vsel %vm821_vm0, %v4452_v43, 0.0 }
 0x480   : > { %1238 = vadd.xlane.f32.xlu1 %v1237_v45  ;;  %v1234_v46 = vsel %vm821_vm0, %v4454_v44, 0.0 }
 0x481   : > { %1235 = vadd.xlane.f32.xlu0 %v1234_v46  ;;  %v820_v46 = vld [vmem:[%s4352_s25 + $0x78] sm:$0xff] }
 0x4e2   : > { %v1197_v53 = vpop.xlane.xlu0 %1196 }
 0x4e3   : > { %v1213_v54 = vsub.f32 %v2994_v25, %v1197_v53 }
 0x4e5   : > { %v1224_v55 = vmul.f32 1.442695, %v1213_v54 }
 0x4e6   : > { %v1194_v56 = vpop.xlane.xlu0 %1193 }
 0x4e7   : > { %3578 = vpow2.f32 %v1224_v55  ;;  %v1212_v57 = vsub.f32 %v995_v26, %v1194_v56 }
 0x4e9   : > { %v1222_v58 = vmul.f32 1.442695, %v1212_v57 }
 0x4eb   : > { %3580 = vpow2.f32 %v1222_v58 }
 0x4f1   : > { %v4464_v59 = vpop.eup %3578 }
 0x4f2   : > { %v1203_v60 = vpop.xlane.xlu1 %1202  ;;  %v1243_v61 = vsel %vm821_vm0, %v4464_v59, 0.0 }
 0x4f3   : > { %v1215_v62 = vsub.f32 %v3005_v29, %v1203_v60  ;;  %v1200_v63 = vpop.xlane.xlu0 %1199  ;;  %1244 = vadd.xlane.f32.xlu1 %v1243_v61  ;;  %v813_v29 = vld [vmem:[%s4352_s25 + $0x40] sm:$0xff] }
 0x4f4   : > { %v1214_v2 = vsub.f32 %v1086_v30, %v1200_v63  ;;  %v814_v30 = vld [vmem:[%s4352_s25 + $0x48] sm:$0xff] }
 0x4f5   : > { %v4468_v3 = vpop.eup %3580  ;;  %v1228_v4 = vmul.f32 1.442695, %v1215_v62  ;;  %v3192_v31 = vpack.c.bf16 %v814_v30, %v813_v29  ;;  %v1644_v30 = vld [vmem:[#allocation10 + $0x70] sm:$0xff] }
 0x4f6   : > { %v1226_v5 = vmul.f32 1.442695, %v1214_v2  ;;  %v1240_v6 = vsel %vm821_vm0, %v4468_v3, 0.0 }
 0x4f7   : > { %3582 = vpow2.f32 %v1228_v4  ;;  %1241 = vadd.xlane.f32.xlu0 %v1240_v6  ;;  %3193 = vmatprep.subr.bf16.mxu0 %v3192_v31  ;;  %v1631_v4 = vld [vmem:[#allocation10 + $0x8] sm:$0xff]  ;;  %v1632_v6 = vld [vmem:[#allocation10 + $0x10] sm:$0xff] }
 0x4f8   : > { %3584 = vpow2.f32 %v1226_v5 }
 0x501   : > { %v4472_v7 = vpop.eup %3582 }
 0x502   : > { %v4474_v8 = vpop.eup %3584  ;;  %v1209_v9 = vpop.xlane.xlu1 %1208  ;;  %v1249_v10 = vsel %vm821_vm0, %v4472_v7, 0.0 }
 0x503   : > { %v1217_v11 = vsub.f32 %v3016_v39, %v1209_v9  ;;  %1250 = vadd.xlane.f32.xlu1 %v1249_v10  ;;  %v1206_v12 = vpop.xlane.xlu0 %1205  ;;  %v1246_v13 = vsel %vm821_vm0, %v4474_v8, 0.0  ;;  %v817_v39 = vld [vmem:[%s4352_s25 + $0x60] sm:$0xff]  ;;  %v1635_v10 = vld [vmem:[#allocation10 + $0x28] sm:$0xff] }
 0x504   : > { %v1216_v14 = vsub.f32 %v1177_v40, %v1206_v12  ;;  %1247 = vadd.xlane.f32.xlu0 %v1246_v13  ;;  %v818_v40 = vld [vmem:[%s4352_s25 + $0x68] sm:$0xff] }
 0x505   : > { %v1232_v15 = vmul.f32 1.442695, %v1217_v11  ;;  %v3200_v41 = vpack.c.bf16 %v818_v40, %v817_v39 }
 0x506   : > { %v1230_v16 = vmul.f32 1.442695, %v1216_v14  ;;  %v1636_v14 = vld [vmem:[#allocation10 + $0x30] sm:$0xff] }
 0x507   : > { %3586 = vpow2.f32 %v1232_v15  ;;  %3201 = vmatprep.subr.bf16.mxu1 %v3200_v41  ;;  %v1637_v15 = vld [vmem:[#allocation10 + $0x38] sm:$0xff] }
 0x508   : > { %3588 = vpow2.f32 %v1230_v16  ;;  %v3220_v17 = vpack.c.bf16 %v1637_v15, %v1636_v14  ;;  %v1788_v14 = vld [vmem:[#allocation11 + $0x90] sm:$0xff] }
 0x50d   : > { %v1239_v22 = vpop.xlane.xlu1 %1238 }
 0x50e   : > { %3590 = vrcp.f32 %v1239_v22  ;;  %v1236_v24 = vpop.xlane.xlu0 %1235  ;;  %v1641_v22 = vld [vmem:[#allocation10 + $0x58] sm:$0xff] }
 0x50f   : > { %3592 = vrcp.f32 %v1236_v24  ;;  %v3228_v23 = vpack.c.bf16 %v1641_v22, %v1640_v20  ;;  %v1642_v24 = vld [vmem:[#allocation10 + $0x60] sm:$0xff]  ;;  %v1813_v22 = vld [vmem:[#allocation11 + $0x158] sm:$0xff] }
 0x511   : > { %v3587_v25 = vpop.eup %3586 }
 0x512   : > { %v3589_v26 = vpop.eup %3588  ;;  %v1255_v27 = vsel %vm821_vm0, %v3587_v25, 0.0 }
 0x513   : > { %1256 = vadd.xlane.f32.xlu1 %v1255_v27  ;;  %v1252_v28 = vsel %vm821_vm0, %v3589_v26, 0.0 }
 0x514   : > { %1253 = vadd.xlane.f32.xlu0 %v1252_v28 }
 0x518   : > { %v3591_v32 = vpop.eup %3590 }
 0x519   : > { %v3593_v33 = vpop.eup %3592  ;;  %v1267_v37 = vmul.f32 %v3591_v32, %v4452_v43  ;;  %v819_v43 = vld [vmem:[%s4352_s25 + $0x70] sm:$0xff] }
 0x51a   : > { %v1266_v36 = vmul.f32 %v3593_v33, %v4454_v44  ;;  %v3204_v52 = vpack.c.bf16 %v820_v46, %v819_v43 }
 0x51c   : > { %3025 = vmatprep.mubr.msk.f32.mxu0 %vm821_vm0, %v1266_v36 }
 0x51d   : > { %3026 = vmatmul.mubr.msk.f32.vlgmr.msra.gmra.mrb[2].mxu0 %vm821_vm0, %v1267_v37 }
 0x51e   : > { %3195 = vmatpush3.bf16.msra.mxu0 %v3192_v31  ;;  %v1645_v31 = vld [vmem:[#allocation10 + $0x78] sm:$0xff] }
 0x51f   : > { %3197 = vmatprep.subr.bf16.mxu0 %v3196_v38  ;;  %v3236_v32 = vpack.c.bf16 %v1645_v31, %v1644_v30 }
 0x522   : > { %3199 = vmatpush3.bf16.msra.mxu0 %v3196_v38 }
 0x580   : > { %v1245_v42 = vpop.xlane.xlu1 %1244 }
 0x581   : > { %3594 = vrcp.f32 %v1245_v42 }
 0x584   : > { %v1242_v45 = vpop.xlane.xlu0 %1241 }
 0x585   : > { %3596 = vrcp.f32 %v1242_v45 }
 0x58b   : > { %v3595_v44 = vpop.eup %3594 }
 0x58c   : > { %v1269_v50 = vmul.f32 %v3595_v44, %v4464_v59 }
 0x58f   : > { %v3597_v47 = vpop.eup %3596 }
 0x590   : > { %v1251_v48 = vpop.xlane.xlu1 %1250  ;;  %v1268_v49 = vmul.f32 %v3597_v47, %v4468_v3  ;;  %v1630_v3 = vld [vmem:[#allocation10] sm:$0xff] }
 0x591   : > { %3598 = vrcp.f32 %v1251_v48  ;;  %v1248_v51 = vpop.xlane.xlu0 %1247  ;;  %v3208_v5 = vpack.c.bf16 %v1631_v4, %v1630_v3 }
 0x592   : > { %3600 = vrcp.f32 %v1248_v51  ;;  %3036 = vmatprep.mubr.msk.f32.mxu1 %vm821_vm0, %v1268_v49  ;;  %v2765_v51 = vld [vmem:[%s4756_s24] ss:$0 sm:$0xff]  ;;  %s3939_s24 = smov [#allocation14]  }
 0x593   : > { %3037 = vmatmul.mubr.msk.f32.vlgmr.msra.gmra.mrb[8].mxu1 %vm821_vm0, %v1269_v50  ;;  %3209 = vmatprep.subr.bf16.mxu0 %v3208_v5  ;;  %s3832_s22 = sshll.u32 %s3939_s24, 4  ;;  %s3833_s22 = int_to_ptr.vmem [resolvable:$false] %s3832_s22 }
 0x594   : > { %3203 = vmatpush3.bf16.msra.mxu1 %v3200_v41  ;;  %s3834_s11 = scalar_lea.vmem %s3833_s22, 512  ;;  %p3835_p13 = scmp.lt.s32.totalorder %s4602_s19, %s3833_s22 }
 0x595   : > { %3205 = vmatprep.subr.bf16.mxu1 %v3204_v52  ;;  %p3836_p12 = scmp.lt.s32.totalorder %s3834_s11, %s3828_s28 }
 0x597   : > { %p3837_p9 = por %p3836_p12, %p3835_p13 }
 0x598   : > { %3207 = vmatpush3.bf16.msra.mxu1 %v3204_v52 }
 0x599   : > { %p3838_p0 = pnand %p3837_p9, %p3831_p1 }
 0x59b   : > { %v3599_v53 = vpop.eup %3598 }
 0x59c   : > { %v3601_v54 = vpop.eup %3600  ;;  %v1271_v56 = vmul.f32 %v3599_v53, %v4472_v7  ;;  %v1633_v7 = vld [vmem:[#allocation10 + $0x18] sm:$0xff] }
 0x59d   : > { %v1270_v55 = vmul.f32 %v3601_v54, %v4474_v8  ;;  %v1634_v8 = vld [vmem:[#allocation10 + $0x20] sm:$0xff]  ;;  %v3212_v9 = vpack.c.bf16 %v1633_v7, %v1632_v6  ;;  %v1780_v6 = vld [vmem:[#allocation11 + $0x50] sm:$0xff] }
 0x59e   : > { %v3216_v11 = vpack.c.bf16 %v1635_v10, %v1634_v8  ;;  %v1789_v8 = vld [vmem:[#allocation11 + $0x98] sm:$0xff] }
 0x59f   : > { %3047 = vmatprep.mubr.msk.f32.mxu0 %vm821_vm0, %v1270_v55 }
 0x5a0   : > { %v1257_v57 = vpop.xlane.xlu1 %1256  ;;  %3048 = vmatmul.mubr.msk.f32.vlgmr.msra.gmra.mrb[4].mxu0 %vm821_vm0, %v1271_v56 }
 0x5a1   : > { %3602 = vrcp.f32 %v1257_v57  ;;  %v1254_v58 = vpop.xlane.xlu0 %1253  ;;  %3211 = vmatpush3.bf16.msra.mxu0 %v3208_v5  ;;  %v1772_v5 = vld [vmem:[#allocation11 + $0x10] sm:$0xff] }
 0x5a2   : > { %3604 = vrcp.f32 %v1254_v58  ;;  %3213 = vmatprep.subr.bf16.mxu0 %v3212_v9  ;;  %v1771_v58 = vld [vmem:[#allocation11 + $0x8] sm:$0xff]  ;;  %v3274_v7 = vpack.c.bf16 %v1780_v6, %v1772_v5  ;;  %v1861_v6 = vld [vmem:[#allocation11 + $0x2d8] sm:$0xff] }
 0x5a5   : > { %3215 = vmatpush3.bf16.msra.mxu0 %v3212_v9  ;;  %v1797_v9 = vld [vmem:[#allocation11 + $0xd8] sm:$0xff] }
 0x5a6   : > { %3217 = vmatprep.subr.bf16.mxu0 %v3216_v11 }
 0x5a9   : > { %3219 = vmatpush3.bf16.msra.mxu0 %v3216_v11  ;;  %v3276_v11 = vpack.c.bf16 %v1797_v9, %v1789_v8  ;;  %v1852_v9 = vld [vmem:[#allocation11 + $0x290] sm:$0xff] }
 0x5aa   : > { %3221 = vmatprep.subr.bf16.mxu0 %v3220_v17 }
 0x5ab   : > { %v3603_v59 = vpop.eup %3602 }
 0x5ac   : > { %v3605_v60 = vpop.eup %3604  ;;  %v1273_v62 = vmul.f32 %v3603_v59, %v3587_v25  ;;  %v1643_v25 = vld [vmem:[#allocation10 + $0x68] sm:$0xff] }
 0x5ad   : > { %v1272_v61 = vmul.f32 %v3605_v60, %v3589_v26  ;;  %3223 = vmatpush3.bf16.msra.mxu0 %v3220_v17  ;;  %v3232_v26 = vpack.c.bf16 %v1643_v25, %v1642_v24  ;;  %v1779_v59 = vld [vmem:[#allocation11 + $0x48] sm:$0xff]  ;;  %v1773_v60 = vld [vmem:[#allocation11 + $0x18] sm:$0xff]  ;;  %v1810_v25 = vld [vmem:[#allocation11 + $0x140] sm:$0xff] }
 0x5ae   : > { %3225 = vmatprep.subr.bf16.mxu0 %v3224_v21  ;;  %v1803_v17 = vld [vmem:[#allocation11 + $0x108] sm:$0xff] }
 0x5af   : > { %3058 = vmatprep.mubr.msk.f32.mxu1 %vm821_vm0, %v1272_v61  ;;  %v3240_v61 = vpack.c.bf16 %v1779_v59, %v1771_v58  ;;  %v3248_v20 = vpack.c.bf16 %v1811_v18, %v1803_v17  ;;  %v1842_v58 = vld [vmem:[#allocation11 + $0x240] sm:$0xff] }
 0x5b0   : > { %3059 = vmatmul.mubr.msk.f32.vlgmr.msra.gmra.mrb[10].mxu1 %vm821_vm0, %v1273_v62  ;;  %v1781_v62 = vld [vmem:[#allocation11 + $0x58] sm:$0xff]  ;;  %v1866_v17 = vld [vmem:[#allocation11 + $0x300] sm:$0xff] }
 0x5b1   : > { %3227 = vmatpush3.bf16.msra.mxu0 %v3224_v21  ;;  %v3272_v3 = vpack.c.bf16 %v1781_v62, %v1773_v60  ;;  %3241 = vmatprep.subr.bf16.mxu1 %v3240_v61  ;;  %v1805_v21 = vld [vmem:[#allocation11 + $0x118] sm:$0xff]  ;;  %v1836_v61 = vld [vmem:[#allocation11 + $0x210] sm:$0xff]  ;;  %v1874_v18 = vld [vmem:[#allocation11 + $0x340] sm:$0xff] }
 0x5b2   : > { %3229 = vmatprep.subr.bf16.mxu0 %v3228_v23  ;;  %v3280_v24 = vpack.c.bf16 %v1813_v22, %v1805_v21  ;;  %v1844_v62 = vld [vmem:[#allocation11 + $0x250] sm:$0xff] }
 0x5b3   : > { %v1868_v21 = vld [vmem:[#allocation11 + $0x310] sm:$0xff] }
 0x5b4   : > { %v1876_v22 = vld [vmem:[#allocation11 + $0x350] sm:$0xff] }
 0x5b5   : > { %3231 = vmatpush3.bf16.msra.mxu0 %v3228_v23  ;;  %v1802_v23 = vld [vmem:[#allocation11 + $0x100] sm:$0xff] }
 0x5b6   : > { %3233 = vmatprep.subr.bf16.mxu0 %v3232_v26 }
 0x5b9   : > { %3235 = vmatpush3.bf16.msra.mxu0 %v3232_v26  ;;  %v1804_v26 = vld [vmem:[#allocation11 + $0x110] sm:$0xff] }
 0x5ba   : > { %3237 = vmatprep.subr.bf16.mxu0 %v3236_v32 }
 0x5bd   : > { %3239 = vmatpush3.bf16.msra.mxu0 %v3236_v32 }
 0x5be   : > { %3273 = vmatprep.subr.bf16.mxu0 %v3272_v3  ;;  %v1859_v3 = vld [vmem:[#allocation11 + $0x2c8] sm:$0xff] }
 0x5f0   : > { %v4508_v63 = vpop.f32.mrb[2].mxu0 }
 0x5f1   : > { %v4510_v2 = vpop.f32.mrb[3].mxu0 }
 0x666   : > { %v3038_v12 = vpop.f32.mrb[8].mxu1 }
 0x667   : > { %v1427_v13 = vpop.f32.mrb[9].mxu1 }
 0x668   : > { %v3555_v16 = vpack.i.bf16 %v3038_v12, %v1427_v13  ;;  %v1786_v12 = vld [vmem:[#allocation11 + $0x80] sm:$0xff] }
 0x669   : > { %v1794_v13 = vld [vmem:[#allocation11 + $0xc0] sm:$0xff] }
 0x66a   : > { %3556 = vrot.lane.b32.xlu0 %v3555_v16, %s3937_s5  ;;  %v3246_v15 = vpack.c.bf16 %v1794_v13, %v1786_v12  ;;  %v1796_v16 = vld [vmem:[#allocation11 + $0xd0] sm:$0xff]  ;;  %v1867_v12 = vld [vmem:[#allocation11 + $0x308] sm:$0xff]  ;;  %s4763_s5 = sld [smem:[#allocation40_spill]] }
 0x66b   : > { %v3278_v19 = vpack.c.bf16 %v1796_v16, %v1788_v14  ;;  %v1875_v13 = vld [vmem:[#allocation11 + $0x348] sm:$0xff]  ;;  %v1869_v14 = vld [vmem:[#allocation11 + $0x318] sm:$0xff] }
 0x66c   : > { %v1877_v16 = vld [vmem:[#allocation11 + $0x358] sm:$0xff] }
 0x670   : > { %s4607_s13 = scalar_lea.hbm %s4763_s5, %s2777_s21 }
 0x673   : > { %v3049_v27 = vpop.f32.mrb[4].mxu0 }
 0x674   : > { %v1508_v28 = vpop.f32.mrb[5].mxu0 }
 0x675   : > { %v3560_v29 = vpack.i.bf16 %v3049_v27, %v1508_v28  ;;  %v1812_v27 = vld [vmem:[#allocation11 + $0x150] sm:$0xff]  ;;  %v3250_v28 = vpack.c.bf16 %v1810_v25, %v1802_v23  ;;  %v1883_v23 = vld [vmem:[#allocation11 + $0x388] sm:$0xff]  ;;  %v3298_v25 = vpack.c.bf16 %v1876_v22, %v1868_v21 }
 0x677   : > { %3561 = vrot.lane.b32.xlu1 %v3560_v29, %s3936_s4  ;;  %v3282_v29 = vpack.c.bf16 %v1812_v27, %v1804_v26  ;;  %v1891_v26 = vld [vmem:[#allocation11 + $0x3c8] sm:$0xff]  ;;  %v1885_v27 = vld [vmem:[#allocation11 + $0x398] sm:$0xff] }
 0x683   : > { %v3060_v33 = vpop.f32.mrb[10].mxu1 }
 0x684   : > { %v1589_v34 = vpop.f32.mrb[11].mxu1 }
 0x685   : > { %v3565_v35 = vpack.i.bf16 %v3060_v33, %v1589_v34 }
 0x687   : > { %3566 = vrot.lane.b32.xlu1 %v3565_v35, %s3935_s26 }
 0x6dc   : > { %v3557_v36 = vpop.permute.xlu0 %3556 }
 0x6dd   : > { %v3559_v38 = vunpack.i.h.bf16 %v3557_v36  ;;  %v3558_v39 = vunpack.i.l.bf16 %v3557_v36 }
 0x6df   : > { %v1623_v45 = vsel %vm821_vm0, %v4508_v63, %v3559_v38  ;;  %v1622_v46 = vsel %vm821_vm0, %v4510_v2, %v3558_v39  ;;  %v1770_v63 = vld [vmem:[#allocation11] sm:$0xff]  ;;  %v1819_v38 = vld [vmem:[#allocation11 + $0x188] sm:$0xff] }
 0x6e0   : > { %v1778_v2 = vld [vmem:[#allocation11 + $0x40] sm:$0xff]  ;;  %v1827_v39 = vld [vmem:[#allocation11 + $0x1c8] sm:$0xff] }
 0x6e1   : > { %v3242_v4 = vpack.c.bf16 %v1778_v2, %v1770_v63  ;;  %v3290_v63 = vpack.c.bf16 %v1844_v62, %v1836_v61  ;;  %v1851_v2 = vld [vmem:[#allocation11 + $0x288] sm:$0xff] }
 0x6e2   : > { %v3260_v5 = vpack.c.bf16 %v1859_v3, %v1851_v2  ;;  %v1791_v61 = vld [vmem:[#allocation11 + $0xa8] sm:$0xff]  ;;  %v1793_v2 = vld [vmem:[#allocation11 + $0xb8] sm:$0xff] }
 0x6e3   : > { %3243 = vmatpush1.bf16.msra.mxu1 %v3242_v4  ;;  %v1853_v4 = vld [vmem:[#allocation11 + $0x298] sm:$0xff] }
 0x6e4   : > { %v1801_v3 = vld [vmem:[#allocation11 + $0xf8] sm:$0xff] }
 0x6e9   : > { %v3562_v37 = vpop.permute.xlu1 %3561 }
 0x6ea   : > { %v3564_v40 = vunpack.i.h.bf16 %v3562_v37  ;;  %v3563_v41 = vunpack.i.l.bf16 %v3562_v37 }
 0x6ec   : > { %v1625_v47 = vsel %vm1624_vm2, %v1622_v46, %v3563_v41  ;;  %v1626_v48 = vsel %vm1624_vm2, %v1623_v45, %v3564_v40  ;;  %v1821_v40 = vld [vmem:[#allocation11 + $0x198] sm:$0xff]  ;;  %v3252_v41 = vpack.c.bf16 %v1827_v39, %v1819_v38  ;;  %v1818_v45 = vld [vmem:[#allocation11 + $0x180] sm:$0xff]  ;;  %v1775_v38 = vld [vmem:[#allocation11 + $0x28] sm:$0xff] }
 0x6ed   : > { %v1783_v39 = vld [vmem:[#allocation11 + $0x68] sm:$0xff] }
 0x6f9   : > { %v3567_v42 = vpop.permute.xlu1 %3566 }
 0x6fa   : > { %v3569_v44 = vunpack.i.h.bf16 %v3567_v42  ;;  %v3568_v43 = vunpack.i.l.bf16 %v3567_v42  ;;  %v1829_v42 = vld [vmem:[#allocation11 + $0x1d8] sm:$0xff] }
 0x6fc   : > { %v1628_v49 = vsel %vm1627_vm3, %v1625_v47, %v3568_v43  ;;  %v1629_v50 = vsel %vm1627_vm3, %v1626_v48, %v3569_v44  ;;  %v1826_v44 = vld [vmem:[#allocation11 + $0x1c0] sm:$0xff]  ;;  %v3284_v43 = vpack.c.bf16 %v1829_v42, %v1821_v40  ;;  %v1820_v47 = vld [vmem:[#allocation11 + $0x190] sm:$0xff]  ;;  %v1777_v42 = vld [vmem:[#allocation11 + $0x38] sm:$0xff] }
 0x6fd   : > { %3093 = vmatprep.mubr.f32.mxu0 %v1628_v49  ;;  %v3254_v46 = vpack.c.bf16 %v1826_v44, %v1818_v45  ;;  %v1828_v48 = vld [vmem:[#allocation11 + $0x1d0] sm:$0xff]  ;;  %v1785_v45 = vld [vmem:[#allocation11 + $0x78] sm:$0xff] }
 0x6fe   : > { %3094 = vmatmul.mubr.f32.vlgmr.msra.gmra.mrb[6].mxu0 %v1629_v50  ;;  %v3286_v49 = vpack.c.bf16 %v1828_v48, %v1820_v47  ;;  %v1835_v50 = vld [vmem:[#allocation11 + $0x208] sm:$0xff]  ;;  %v3336_v44 = vpack.c.bf16 %v1785_v45, %v1777_v42  ;;  %v1841_v42 = vld [vmem:[#allocation11 + $0x238] sm:$0xff] }
 0x6ff   : > { %3275 = vmatpush1.bf16.msra.mxu0 %v3274_v7  ;;  %v1858_v7 = vld [vmem:[#allocation11 + $0x2c0] sm:$0xff]  ;;  %v1849_v45 = vld [vmem:[#allocation11 + $0x278] sm:$0xff] }
 0x700   : > { %3277 = vmatprep.subr.bf16.mxu0 %v3276_v11 }
 0x703   : > { %3279 = vmatpush1.bf16.msra.mxu0 %v3278_v19  ;;  %v3296_v19 = vpack.c.bf16 %v1877_v16, %v1869_v14  ;;  %v1809_v14 = vld [vmem:[#allocation11 + $0x138] sm:$0xff] }
 0x704   : > { %3281 = vmatprep.subr.bf16.mxu0 %v3280_v24  ;;  %v3938_v24 = vmov 0.0  }
 0x705   : > { %2004 = vmatprep.mubr.f32.mxu1 %v3938_v24  ;;  %2081 = vmatprep.mubr.f32.mxu0 %v3938_v24 }
 0x707   : > { %3283 = vmatpush1.bf16.msra.mxu0 %v3282_v29  ;;  %v3268_v29 = vpack.c.bf16 %v1891_v26, %v1883_v23  ;;  %v1808_v23 = vld [vmem:[#allocation11 + $0x130] sm:$0xff]  ;;  %v1823_v26 = vld [vmem:[#allocation11 + $0x1a8] sm:$0xff] }
 0x708   : > { %3285 = vmatprep.subr.bf16.mxu0 %v3284_v43 }
 0x70b   : > { %3287 = vmatpush1.bf16.msra.mxu0 %v3286_v49 }
 0x7d1   : > { %v3095_v52 = vpop.f32.mrb[6].mxu0 }
 0x7d2   : > { %v1725_v53 = vadd.f32 %v3095_v52, %v2765_v51  ;;  %v1719_v54 = vpop.f32.mrb[7].mxu0  ;;  %v1837_v52 = vld [vmem:[#allocation11 + $0x218] sm:$0xff] }
 0x7d3   : > { %v1720_v55 = vadd.f32 %v2765_v51, %v1719_v54  ;;  %v1843_v51 = vld [vmem:[#allocation11 + $0x248] sm:$0xff]  ;;  %v1845_v54 = vld [vmem:[#allocation11 + $0x258] sm:$0xff] }
 0x7d4   : > { %v4523_v56 = vadd.f32 %v1725_v53, %v4365_v1  ;;  %v1787_v1 = vld [vmem:[#allocation11 + $0x88] sm:$0xff]  ;;  %v3256_v53 = vpack.c.bf16 %v1843_v51, %v1835_v50  ;;  %v3288_v59 = vpack.c.bf16 %v1845_v54, %v1837_v52  ;;  %v2766_v52 = vld [vmem:[%s4757_s29] ss:$0 sm:$0xff] }
 0x7d5   : > { %v4526_v57 = vadd.f32 %v1720_v55, %v4362_v0  ;;  %v1795_v0 = vld [vmem:[#allocation11 + $0xc8] sm:$0xff]  ;;  %v1834_v55 = vld [vmem:[#allocation11 + $0x200] sm:$0xff] }
 0x7d6   : > { %1732 = vadd.xlane.f32.xlu0 %v4523_v56  ;;  %v3244_v10 = vpack.c.bf16 %v1795_v0, %v1787_v1  ;;  %v3258_v60 = vpack.c.bf16 %v1842_v58, %v1834_v55  ;;  %3289 = vmatprep.subr.bf16.mxu0 %v3288_v59  ;;  %v1850_v1 = vld [vmem:[#allocation11 + $0x280] sm:$0xff]  ;;  %v3292_v0 = vpack.c.bf16 %v1861_v6, %v1853_v4  ;;  %v1776_v58 = vld [vmem:[#allocation11 + $0x30] sm:$0xff] }
 0x7d7   : > { %1730 = vadd.xlane.f32.xlu1 %v4526_v57  ;;  %3291 = vmatpush1.bf16.msra.mxu0 %v3290_v63  ;;  %v3262_v8 = vpack.c.bf16 %v1858_v7, %v1850_v1  ;;  %v1782_v55 = vld [vmem:[#allocation11 + $0x60] sm:$0xff]  ;;  %v1784_v59 = vld [vmem:[#allocation11 + $0x70] sm:$0xff]  ;;  %v1799_v63 = vld [vmem:[#allocation11 + $0xe8] sm:$0xff] }
 0x7d8   : > { %3245 = vmatprep.subr.bf16.mxu1 %v3244_v10  ;;  %v1860_v10 = vld [vmem:[#allocation11 + $0x2d0] sm:$0xff]  ;;  %3293 = vmatprep.subr.bf16.mxu0 %v3292_v0  ;;  %v3338_v6 = vpack.c.bf16 %v1784_v59, %v1776_v58  ;;  %v1790_v1 = vld [vmem:[#allocation11 + $0xa0] sm:$0xff] }
 0x7d9   : > { %3247 = vmatpush1.bf16.msra.mxu1 %v3246_v15  ;;  %v3294_v11 = vpack.c.bf16 %v1860_v10, %v1852_v9  ;;  %v3264_v15 = vpack.c.bf16 %v1875_v13, %v1867_v12  ;;  %v1798_v7 = vld [vmem:[#allocation11 + $0xe0] sm:$0xff]  ;;  %v1800_v9 = vld [vmem:[#allocation11 + $0xf0] sm:$0xff]  ;;  %v1807_v10 = vld [vmem:[#allocation11 + $0x128] sm:$0xff]  ;;  %v3340_v12 = vpack.c.bf16 %v1801_v3, %v1793_v2 }
 0x7da   : > { %3249 = vmatprep.subr.bf16.mxu1 %v3248_v20  ;;  %v3266_v20 = vpack.c.bf16 %v1874_v18, %v1866_v17  ;;  %v1815_v13 = vld [vmem:[#allocation11 + $0x168] sm:$0xff]  ;;  %v3310_v17 = vpack.c.bf16 %v1798_v7, %v1790_v1  ;;  %v1856_v2 = vld [vmem:[#allocation11 + $0x2b0] sm:$0xff]  ;;  %v1881_v1 = vld [vmem:[#allocation11 + $0x378] sm:$0xff] }
 0x7db   : > { %3295 = vmatpush1.bf16.msra.mxu0 %v3294_v11  ;;  %v3308_v11 = vpack.c.bf16 %v1799_v63, %v1791_v61  ;;  %v3312_v21 = vpack.c.bf16 %v1815_v13, %v1807_v10  ;;  %v1862_v61 = vld [vmem:[#allocation11 + $0x2e0] sm:$0xff]  ;;  %v1864_v3 = vld [vmem:[#allocation11 + $0x2f0] sm:$0xff] }
 0x7dc   : > { %3297 = vmatprep.subr.bf16.mxu0 %v3296_v19  ;;  %v1806_v19 = vld [vmem:[#allocation11 + $0x120] sm:$0xff]  ;;  %v1880_v13 = vld [vmem:[#allocation11 + $0x370] sm:$0xff] }
 0x7dd   : > { %3251 = vmatpush1.bf16.msra.mxu1 %v3250_v28  ;;  %v1893_v28 = vld [vmem:[#allocation11 + $0x3d8] sm:$0xff] }
 0x7de   : > { %3253 = vmatprep.subr.bf16.mxu1 %v3252_v41  ;;  %v3304_v41 = vpack.c.bf16 %v1783_v39, %v1775_v38  ;;  %v1824_v38 = vld [vmem:[#allocation11 + $0x1b0] sm:$0xff] }
 0x7df   : > { %3299 = vmatpush1.bf16.msra.mxu0 %v3298_v25  ;;  %v1816_v25 = vld [vmem:[#allocation11 + $0x170] sm:$0xff] }
 0x7e0   : > { %v1832_v39 = vld [vmem:[#allocation11 + $0x1f0] sm:$0xff] }
 0x7e1   : > { %3255 = vmatpush1.bf16.msra.mxu1 %v3254_v46 }
 0x7e2   : > { %3257 = vmatprep.subr.bf16.mxu1 %v3256_v53  ;;  %v1774_v53 = vld [vmem:[#allocation11 + $0x20] sm:$0xff] }
 0x7e5   : > { %3259 = vmatpush1.bf16.msra.mxu1 %v3258_v60  ;;  %v2767_v60 = vld [vmem:[%s4758_s10] ss:$0 sm:$0xff] }
 0x7e6   : > { %3261 = vmatprep.subr.bf16.mxu1 %v3260_v5  ;;  %v3306_v5 = vpack.c.bf16 %v1782_v55, %v1774_v53  ;;  %v1863_v53 = vld [vmem:[#allocation11 + $0x2e8] sm:$0xff]  ;;  %v1865_v55 = vld [vmem:[#allocation11 + $0x2f8] sm:$0xff] }
 0x7e9   : > { %3263 = vmatpush1.bf16.msra.mxu1 %v3262_v8  ;;  %v1792_v8 = vld [vmem:[#allocation11 + $0xb0] sm:$0xff] }
 0x7ea   : > { %3265 = vmatprep.subr.bf16.mxu1 %v3264_v15  ;;  %v1817_v15 = vld [vmem:[#allocation11 + $0x178] sm:$0xff]  ;;  %v3342_v18 = vpack.c.bf16 %v1800_v9, %v1792_v8  ;;  %v1870_v8 = vld [vmem:[#allocation11 + $0x320] sm:$0xff] }
 0x7eb   : > { %v3344_v22 = vpack.c.bf16 %v1817_v15, %v1809_v14  ;;  %v1878_v9 = vld [vmem:[#allocation11 + $0x360] sm:$0xff]  ;;  %v1887_v14 = vld [vmem:[#allocation11 + $0x3a8] sm:$0xff] }
 0x7ec   : > { %v1895_v15 = vld [vmem:[#allocation11 + $0x3e8] sm:$0xff] }
 0x7ed   : > { %3267 = vmatpush1.bf16.msra.mxu1 %v3266_v20  ;;  %v1814_v20 = vld [vmem:[#allocation11 + $0x160] sm:$0xff] }
 0x7ee   : > { %3269 = vmatprep.subr.bf16.mxu1 %v3268_v29  ;;  %v1833_v29 = vld [vmem:[#allocation11 + $0x1f8] sm:$0xff] }
 0x863   : > { %v1733_v30 = vpop.xlane.xlu0 %1732 }
 0x864   : > { %v1731_v31 = vpop.xlane.xlu1 %1730  ;;  %v1735_v32 = vmul.f32 0.0078125, %v1733_v30  ;;  %v3300_v30 = vpack.c.bf16 %v1893_v28, %v1885_v27  ;;  %v1831_v27 = vld [vmem:[#allocation11 + $0x1e8] sm:$0xff]  ;;  %v1825_v28 = vld [vmem:[#allocation11 + $0x1b8] sm:$0xff] }
 0x865   : > { %v1734_v33 = vmul.f32 0.0078125, %v1731_v31  ;;  %v1882_v31 = vld [vmem:[#allocation11 + $0x380] sm:$0xff] }
 0x866   : > { %v4534_v35 = vsub.f32 %v4523_v56, %v1735_v32  ;;  %v1890_v32 = vld [vmem:[#allocation11 + $0x3c0] sm:$0xff]  ;;  %3301 = vmatprep.subr.bf16.mxu0 %v3300_v30  ;;  %v3314_v30 = vpack.c.bf16 %v1814_v20, %v1806_v19 }
 0x867   : > { %v4531_v34 = vsub.f32 %v4526_v57, %v1734_v33  ;;  %v1884_v33 = vld [vmem:[#allocation11 + $0x390] sm:$0xff]  ;;  %v1886_v20 = vld [vmem:[#allocation11 + $0x3a0] sm:$0xff] }
 0x868   : > { %v1739_v37 = vmul.f32 %v4534_v35, %v4534_v35 }
 0x869   : > { %v1738_v36 = vmul.f32 %v4531_v34, %v4531_v34 }
 0x86b   : > { %1740 = vadd.xlane.f32.xlu0 %v1738_v36  ;;  %v3270_v36 = vpack.c.bf16 %v1890_v32, %v1882_v31  ;;  %v3346_v31 = vpack.c.bf16 %v1816_v25, %v1808_v23  ;;  %v1822_v32 = vld [vmem:[#allocation11 + $0x1a0] sm:$0xff]  ;;  %v1888_v25 = vld [vmem:[#allocation11 + $0x3b0] sm:$0xff] }
 0x86c   : > { %v1894_v23 = vld [vmem:[#allocation11 + $0x3e0] sm:$0xff] }
 0x86d   : > { %3271 = vmatpush1.bf16.msra.mxu1 %v3270_v36  ;;  %v3316_v36 = vpack.c.bf16 %v1831_v27, %v1823_v26  ;;  %v1896_v26 = vld [vmem:[#allocation11 + $0x3f0] sm:$0xff]  ;;  %v3334_v27 = vpack.c.bf16 %v1894_v23, %v1886_v20  ;;  %v2305_v20 = vld [vmem:[#allocation13 + $0x48] sm:$0xff]  ;;  %v2336_v23 = vld [vmem:[#allocation13 + $0x140] sm:$0xff] }
 0x86e   : > { %3305 = vmatprep.subr.bf16.mxu1 %v3304_v41  ;;  %v1847_v41 = vld [vmem:[#allocation11 + $0x268] sm:$0xff] }
 0x86f   : > { %1742 = vadd.xlane.f32.xlu0 %v1739_v37  ;;  %v1892_v37 = vld [vmem:[#allocation11 + $0x3d0] sm:$0xff] }
 0x870   : > { %v3302_v40 = vpack.c.bf16 %v1892_v37, %v1884_v33  ;;  %v1830_v33 = vld [vmem:[#allocation11 + $0x1e0] sm:$0xff]  ;;  %v3348_v37 = vpack.c.bf16 %v1833_v29, %v1825_v28  ;;  %v3366_v28 = vpack.c.bf16 %v1896_v26, %v1888_v25  ;;  %v2337_v25 = vld [vmem:[#allocation13 + $0x148] sm:$0xff] }
 0x871   : > { %v2312_v29 = vld [vmem:[#allocation13 + $0x80] sm:$0xff]  ;;  %v3418_v26 = vpack.c.bf16 %v2337_v25, %v2336_v23 }
 0x872   : > { %3303 = vmatpush1.bf16.msra.mxu0 %v3302_v40  ;;  %v1839_v40 = vld [vmem:[#allocation11 + $0x228] sm:$0xff] }
 0x873   : > { %3337 = vmatprep.subr.bf16.mxu0 %v3336_v44  ;;  %v3318_v44 = vpack.c.bf16 %v1830_v33, %v1822_v32  ;;  %v2345_v33 = vld [vmem:[#allocation13 + $0x188] sm:$0xff] }
 0x8f8   : > { %v1741_v43 = vpop.xlane.xlu0 %1740 }
 0x8f9   : > { %v1744_v46 = vmul.f32 0.0078125, %v1741_v43  ;;  %v3350_v43 = vpack.c.bf16 %v1832_v39, %v1824_v38 }
 0x8fb   : > { %v1746_v47 = vadd.f32 1e-05, %v1744_v46  ;;  %v1838_v46 = vld [vmem:[#allocation11 + $0x220] sm:$0xff] }
 0x8fc   : > { %v1743_v48 = vpop.xlane.xlu0 %1742 }
 0x8fd   : > { %3606 = vrsqrt.f32 %v1746_v47  ;;  %v1745_v49 = vmul.f32 0.0078125, %v1743_v48  ;;  %v1846_v47 = vld [vmem:[#allocation11 + $0x260] sm:$0xff]  ;;  %v3320_v48 = vpack.c.bf16 %v1847_v41, %v1839_v40  ;;  %v2329_v41 = vld [vmem:[#allocation13 + $0x108] sm:$0xff] }
 0x8fe   : > { %v3322_v58 = vpack.c.bf16 %v1846_v47, %v1838_v46  ;;  %v2328_v40 = vld [vmem:[#allocation13 + $0x100] sm:$0xff]  ;;  %v2298_v46 = vld [vmem:[#allocation13 + $0x10] sm:$0xff]  ;;  %v2299_v47 = vld [vmem:[#allocation13 + $0x18] sm:$0xff] }
 0x8ff   : > { %v1747_v50 = vadd.f32 1e-05, %v1745_v49  ;;  %v3352_v49 = vpack.c.bf16 %v1849_v45, %v1841_v42  ;;  %v3402_v42 = vpack.c.bf16 %v2329_v41, %v2328_v40  ;;  %v2315_v45 = vld [vmem:[#allocation13 + $0x98] sm:$0xff]  ;;  %v2324_v41 = vld [vmem:[#allocation13 + $0xe0] sm:$0xff] }
 0x901   : > { %3608 = vrsqrt.f32 %v1747_v50  ;;  %v1840_v50 = vld [vmem:[#allocation11 + $0x230] sm:$0xff] }
 0x907   : > { %v3607_v51 = vpop.eup %3606 }
 0x908   : > { %v1750_v54 = vmul.f32 %v3607_v51, %v4531_v34  ;;  %v1848_v51 = vld [vmem:[#allocation11 + $0x270] sm:$0xff] }
 0x909   : > { %v3354_v59 = vpack.c.bf16 %v1848_v51, %v1840_v50  ;;  %v2331_v50 = vld [vmem:[#allocation13 + $0x118] sm:$0xff] }
 0x90a   : > { %v1759_v62 = vmul.f32 %v2766_v52, %v1750_v54  ;;  %v1857_v54 = vld [vmem:[#allocation11 + $0x2b8] sm:$0xff] }
 0x90b   : > { %v3609_v4 = vpop.eup %3608  ;;  %v3356_v63 = vpack.c.bf16 %v1865_v55, %v1857_v54  ;;  %v2348_v54 = vld [vmem:[#allocation13 + $0x1a0] sm:$0xff] }
 0x90c   : > { %v4549_v0 = vadd.f32 %v2767_v60, %v1759_v62  ;;  %v1751_v34 = vmul.f32 %v3609_v4, %v4534_v35  ;;  %v1871_v4 = vld [vmem:[#allocation11 + $0x328] sm:$0xff] }
 0x90e   : > { %2005 = vmatmul.mubr.f32.vlgmr.msra.gmra.mrb[12].mxu1 %v4549_v0  ;;  %2082 = vmatmul.mubr.f32.vlgmr.msra.gmra.mrb[8].mxu0 %v4549_v0  ;;  %v1760_v16 = vmul.f32 %v2766_v52, %v1751_v34  ;;  %v1855_v52 = vld [vmem:[#allocation11 + $0x2a8] sm:$0xff]  ;;  %v3358_v34 = vpack.c.bf16 %v1864_v3, %v1856_v2 }
 0x90f   : > { %3307 = vmatpush1.bf16.msra.mxu1 %v3306_v5  ;;  %3339 = vmatpush1.bf16.msra.mxu0 %v3338_v6  ;;  %v3324_v62 = vpack.c.bf16 %v1863_v53, %v1855_v52  ;;  %v1879_v5 = vld [vmem:[#allocation11 + $0x368] sm:$0xff]  ;;  %v1873_v6 = vld [vmem:[#allocation11 + $0x338] sm:$0xff]  ;;  %v2316_v52 = vld [vmem:[#allocation13 + $0xa0] sm:$0xff] }
 0x910   : > { %2010 = vmatprep.mubr.f32.mxu1 %v3938_v24  ;;  %2087 = vmatprep.mubr.f32.mxu0 %v3938_v24  ;;  %v4556_v35 = vadd.f32 %v2767_v60, %v1760_v16  ;;  %v1854_v60 = vld [vmem:[#allocation11 + $0x2a0] sm:$0xff]  ;;  %v3328_v10 = vpack.c.bf16 %v1879_v5, %v1871_v4  ;;  %v1889_v16 = vld [vmem:[#allocation11 + $0x3b8] sm:$0xff]  ;;  %v2317_v53 = vld [vmem:[#allocation13 + $0xa8] sm:$0xff] }
 0x911   : > { %3309 = vmatprep.subr.bf16.mxu1 %v3308_v11  ;;  %3341 = vmatprep.subr.bf16.mxu0 %v3340_v12  ;;  %v3326_v7 = vpack.c.bf16 %v1862_v61, %v1854_v60  ;;  %v3360_v11 = vpack.c.bf16 %v1881_v1, %v1873_v6  ;;  %v1872_v12 = vld [vmem:[#allocation11 + $0x330] sm:$0xff]  ;;  %v3376_v55 = vpack.c.bf16 %v2317_v53, %v2316_v52  ;;  %v2300_v60 = vld [vmem:[#allocation13 + $0x20] sm:$0xff]  ;;  %v2301_v61 = vld [vmem:[#allocation13 + $0x28] sm:$0xff] }
 0x912   : > { %2011 = vmatmul.mubr.f32.gmra.mrb[14].mxu1 %v4556_v35  ;;  %2088 = vmatmul.mubr.f32.gmra.mrb[10].mxu0 %v4556_v35  ;;  %v3362_v19 = vpack.c.bf16 %v1880_v13, %v1872_v12  ;;  %v2333_v2 = vld [vmem:[#allocation13 + $0x128] sm:$0xff]  ;;  %v2318_v4 = vld [vmem:[#allocation13 + $0xb0] sm:$0xff]  ;;  %v2319_v5 = vld [vmem:[#allocation13 + $0xb8] sm:$0xff] }
 0x913   : > { %3311 = vmatpush1.bf16.msra.mxu1 %v3310_v17  ;;  %3343 = vmatpush1.bf16.msra.mxu0 %v3342_v18  ;;  %v1897_v17 = vld [vmem:[#allocation11 + $0x3f8] sm:$0xff]  ;;  %v3330_v18 = vpack.c.bf16 %v1878_v9, %v1870_v8  ;;  %v2350_v6 = vld [vmem:[#allocation13 + $0x1b0] sm:$0xff]  ;;  %v3380_v1 = vpack.c.bf16 %v2319_v5, %v2318_v4 }
 0x914   : > { %3313 = vmatprep.subr.bf16.mxu1 %v3312_v21  ;;  %3345 = vmatprep.subr.bf16.mxu0 %v3344_v22  ;;  %v3332_v21 = vpack.c.bf16 %v1895_v15, %v1887_v14  ;;  %v3364_v22 = vpack.c.bf16 %v1897_v17, %v1889_v16  ;;  %v2302_v8 = vld [vmem:[#allocation13 + $0x30] sm:$0xff]  ;;  %v2303_v9 = vld [vmem:[#allocation13 + $0x38] sm:$0xff]  ;;  %v2320_v14 = vld [vmem:[#allocation13 + $0xc0] sm:$0xff] }
 0x915   : > { %2158 = vmatprep.mubr.f32.mxu1 %v3938_v24  ;;  %2235 = vmatprep.mubr.f32.mxu0 %v3938_v24  ;;  %v2335_v12 = vld [vmem:[#allocation13 + $0x138] sm:$0xff]  ;;  %v2321_v15 = vld [vmem:[#allocation13 + $0xc8] sm:$0xff]  ;;  %v2352_v16 = vld [vmem:[#allocation13 + $0x1c0] sm:$0xff] }
 0x916   : > { %v3384_v17 = vpack.c.bf16 %v2321_v15, %v2320_v14  ;;  %v2358_v52 = vld [vmem:[#allocation13 + $0x1f0] sm:$0xff]  ;;  %v1898_v14 = vld [vmem:[%s4759_s9] sm:$0xff] }
 0x917   : > { %3315 = vmatpush1.bf16.msra.mxu1 %v3314_v30  ;;  %3347 = vmatpush1.bf16.msra.mxu0 %v3346_v31  ;;  %v2313_v30 = vld [vmem:[#allocation13 + $0x88] sm:$0xff]  ;;  %v2344_v31 = vld [vmem:[#allocation13 + $0x180] sm:$0xff] }
 0x918   : > { %3317 = vmatprep.subr.bf16.mxu1 %v3316_v36  ;;  %3349 = vmatprep.subr.bf16.mxu0 %v3348_v37  ;;  %v3368_v32 = vpack.c.bf16 %v2313_v30, %v2312_v29  ;;  %v2296_v36 = vld [vmem:[#allocation13] sm:$0xff]  ;;  %v2297_v37 = vld [vmem:[#allocation13 + $0x8] sm:$0xff]  ;;  %v3400_v38 = vpack.c.bf16 %v2345_v33, %v2344_v31  ;;  %v2354_v29 = vld [vmem:[#allocation13 + $0x1d0] sm:$0xff] }
 0x919   : > { %v3370_v39 = vpack.c.bf16 %v2297_v37, %v2296_v36  ;;  %v2355_v31 = vld [vmem:[#allocation13 + $0x1d8] sm:$0xff] }
 0x91a   : > { %v2307_v33 = vld [vmem:[#allocation13 + $0x58] sm:$0xff]  ;;  %v3420_v36 = vpack.c.bf16 %v2355_v31, %v2354_v29 }
 0x91b   : > { %3319 = vmatpush1.bf16.msra.mxu1 %v3318_v44  ;;  %3351 = vmatpush1.bf16.msra.mxu0 %v3350_v43  ;;  %v2347_v44 = vld [vmem:[#allocation13 + $0x198] sm:$0xff] }
 0x91c   : > { %3321 = vmatprep.subr.bf16.mxu1 %v3320_v48  ;;  %3353 = vmatprep.subr.bf16.mxu0 %v3352_v49  ;;  %v2330_v48 = vld [vmem:[#allocation13 + $0x110] sm:$0xff]  ;;  %v3374_v49 = vpack.c.bf16 %v2299_v47, %v2298_v46  ;;  %v2340_v47 = vld [vmem:[#allocation13 + $0x160] sm:$0xff] }
 0x91d   : > { %v3406_v51 = vpack.c.bf16 %v2331_v50, %v2330_v48  ;;  %v2341_v48 = vld [vmem:[#allocation13 + $0x168] sm:$0xff]  ;;  %v2326_v50 = vld [vmem:[#allocation13 + $0xf0] sm:$0xff] }
 0x91f   : > { %3323 = vmatpush1.bf16.msra.mxu1 %v3322_v58  ;;  %3355 = vmatpush1.bf16.msra.mxu0 %v3354_v59  ;;  %v2349_v58 = vld [vmem:[#allocation13 + $0x1a8] sm:$0xff] }
 0x920   : > { %3325 = vmatprep.subr.bf16.mxu1 %v3324_v62  ;;  %3357 = vmatprep.subr.bf16.mxu0 %v3356_v63  ;;  %v3408_v59 = vpack.c.bf16 %v2349_v58, %v2348_v54  ;;  %v2332_v62 = vld [vmem:[#allocation13 + $0x120] sm:$0xff]  ;;  %v3378_v63 = vpack.c.bf16 %v2301_v61, %v2300_v60  ;;  %v2359_v54 = vld [vmem:[#allocation13 + $0x1f8] sm:$0xff]  ;;  %v2342_v61 = vld [vmem:[#allocation13 + $0x170] sm:$0xff] }
 0x921   : > { %v3410_v3 = vpack.c.bf16 %v2333_v2, %v2332_v62  ;;  %v2311_v58 = vld [vmem:[#allocation13 + $0x78] sm:$0xff] }
 0x922   : > { %v2343_v62 = vld [vmem:[#allocation13 + $0x178] sm:$0xff] }
 0x923   : > { %3327 = vmatpush1.bf16.msra.mxu1 %v3326_v7  ;;  %3359 = vmatpush1.bf16.msra.mxu0 %v3358_v34  ;;  %v2351_v7 = vld [vmem:[#allocation13 + $0x1b8] sm:$0xff] }
 0x924   : > { %3329 = vmatprep.subr.bf16.mxu1 %v3328_v10  ;;  %3361 = vmatprep.subr.bf16.mxu0 %v3360_v11  ;;  %v3412_v34 = vpack.c.bf16 %v2351_v7, %v2350_v6  ;;  %v2334_v10 = vld [vmem:[#allocation13 + $0x130] sm:$0xff]  ;;  %v3382_v11 = vpack.c.bf16 %v2303_v9, %v2302_v8  ;;  %v1900_v8 = vlaneseq }
 0x925   : > { %v3414_v13 = vpack.c.bf16 %v2335_v12, %v2334_v10 }
 0x926   : > { %v1901_v9 = vshrl.u32 %v1900_v8, 7 }
 0x927   : > { %3331 = vmatpush1.bf16.msra.mxu1 %v3330_v18  ;;  %3363 = vmatpush1.bf16.msra.mxu0 %v3362_v19  ;;  %v2353_v18 = vld [vmem:[#allocation13 + $0x1c8] sm:$0xff]  ;;  %v2304_v19 = vld [vmem:[#allocation13 + $0x40] sm:$0xff] }
 0x928   : > { %3333 = vmatprep.subr.bf16.mxu1 %v3332_v21  ;;  %3365 = vmatprep.subr.bf16.mxu0 %v3364_v22  ;;  %v3416_v21 = vpack.c.bf16 %v2353_v18, %v2352_v16  ;;  %v3386_v22 = vpack.c.bf16 %v2305_v20, %v2304_v19  ;;  %v1918_v10 = vsub.s32 4, %v1901_v9  ;;  %v1922_v12 = vsub.s32 5, %v1901_v9 }
 0x92a   : > { %v1919_v15 = vrot.slane %v1898_v14, %v1918_v10 }
 0x92b   : > { %3335 = vmatpush1.bf16.msra.mxu1 %v3334_v27  ;;  %3367 = vmatpush1.bf16.msra.mxu0 %v3366_v28  ;;  %v2322_v27 = vld [vmem:[#allocation13 + $0xd0] sm:$0xff]  ;;  %v2323_v28 = vld [vmem:[#allocation13 + $0xd8] sm:$0xff] }
 0x92c   : > { %3369 = vmatprep.subr.bf16.mxu1 %v3368_v32  ;;  %3401 = vmatprep.subr.bf16.mxu0 %v3400_v38  ;;  %v3388_v30 = vpack.c.bf16 %v2323_v28, %v2322_v27  ;;  %v2306_v32 = vld [vmem:[#allocation13 + $0x50] sm:$0xff] }
 0x92d   : > { %v3390_v37 = vpack.c.bf16 %v2307_v33, %v2306_v32  ;;  %v2338_v38 = vld [vmem:[#allocation13 + $0x150] sm:$0xff] }
 0x92e   : > { %2159 = vmatmul.mubr.f32.vlgmr.msra.gmra.mrb[16].mxu1 %v4549_v0  ;;  %2236 = vmatmul.mubr.f32.vlgmr.msra.gmra.mrb[12].mxu0 %v4549_v0  ;;  %v2314_v0 = vld [vmem:[#allocation13 + $0x90] sm:$0xff] }
 0x92f   : > { %2164 = vmatprep.mubr.f32.mxu1 %v3938_v24  ;;  %2241 = vmatprep.mubr.f32.mxu0 %v3938_v24  ;;  %v2346_v24 = vld [vmem:[#allocation13 + $0x190] sm:$0xff] }
 0x930   : > { %3371 = vmatpush3.bf16.msra.mxu1 %v3370_v39  ;;  %v3404_v43 = vpack.c.bf16 %v2347_v44, %v2346_v24  ;;  %3403 = vmatpush3.bf16.msra.mxu0 %v3402_v42  ;;  %v2339_v39 = vld [vmem:[#allocation13 + $0x158] sm:$0xff]  ;;  %v2356_v42 = vld [vmem:[#allocation13 + $0x1e0] sm:$0xff]  ;;  %v2357_v24 = vld [vmem:[#allocation13 + $0x1e8] sm:$0xff] }
 0x931   : > { %v3422_v40 = vpack.c.bf16 %v2339_v39, %v2338_v38  ;;  %v2308_v44 = vld [vmem:[#allocation13 + $0x60] sm:$0xff] }
 0x932   : > { %2165 = vmatmul.mubr.f32.gmra.mrb[18].mxu1 %v4556_v35  ;;  %2242 = vmatmul.mubr.f32.gmra.mrb[14].mxu0 %v4556_v35  ;;  %v3372_v35 = vpack.c.bf16 %v2315_v45, %v2314_v0  ;;  %v2325_v0 = vld [vmem:[#allocation13 + $0xe8] sm:$0xff] }
 0x933   : > { %3405 = vmatprep.subr.bf16.mxu0 %v3404_v43  ;;  %v3392_v45 = vpack.c.bf16 %v2325_v0, %v2324_v41  ;;  %v3424_v43 = vpack.c.bf16 %v2357_v24, %v2356_v42  ;;  %v1902_v24 = vsub.s32 0, %v1901_v9 }
 0x934   : > { %3373 = vmatprep.subr.bf16.mxu1 %v3372_v35  ;;  %3407 = vmatpush3.bf16.msra.mxu0 %v3406_v51  ;;  %v2309_v35 = vld [vmem:[#allocation13 + $0x68] sm:$0xff]  ;;  %v2327_v51 = vld [vmem:[#allocation13 + $0xf8] sm:$0xff] }
 0x935   : > { %3375 = vmatpush3.bf16.msra.mxu1 %v3374_v49  ;;  %3409 = vmatprep.subr.bf16.mxu0 %v3408_v59  ;;  %v3394_v46 = vpack.c.bf16 %v2309_v35, %v2308_v44  ;;  %v3426_v49 = vpack.c.bf16 %v2341_v48, %v2340_v47  ;;  %v3396_v53 = vpack.c.bf16 %v2327_v51, %v2326_v50  ;;  %v1910_v35 = vsub.s32 2, %v1901_v9 }
 0x936   : > { %3377 = vmatprep.subr.bf16.mxu1 %v3376_v55  ;;  %v2310_v55 = vld [vmem:[#allocation13 + $0x70] sm:$0xff]  ;;  %v3428_v59 = vpack.c.bf16 %v2359_v54, %v2358_v52  ;;  %v1903_v47 = vrot.slane %v1898_v14, %v1902_v24 }
 0x937   : > { %v3398_v60 = vpack.c.bf16 %v2311_v58, %v2310_v55 }
 0x938   : > { %3411 = vmatpush3.bf16.msra.mxu0 %v3410_v3 }
 0x939   : > { %3379 = vmatpush3.bf16.msra.mxu1 %v3378_v63  ;;  %3413 = vmatprep.subr.bf16.mxu0 %v3412_v34  ;;  %v3430_v63 = vpack.c.bf16 %v2343_v62, %v2342_v61 }
 0x93a   : > { %3381 = vmatprep.subr.bf16.mxu1 %v3380_v1 }
 0x93c   : > { %3415 = vmatpush3.bf16.msra.mxu0 %v3414_v13  ;;  %v1930_v13 = vsub.s32 7, %v1901_v9 }
 0x93d   : > { %3383 = vmatpush3.bf16.msra.mxu1 %v3382_v11  ;;  %3417 = vmatprep.subr.bf16.mxu0 %v3416_v21  ;;  %v1926_v11 = vsub.s32 6, %v1901_v9 }
 0x93e   : > { %3385 = vmatprep.subr.bf16.mxu1 %v3384_v17  ;;  %v1923_v17 = vrot.slane %v1898_v14, %v1922_v12  ;;  %v1931_v18 = vrot.slane %v1898_v14, %v1930_v13 }
 0x93f   : > { %v1927_v16 = vrot.slane %v1898_v14, %v1926_v11 }
 0x940   : > { %3419 = vmatpush3.bf16.msra.mxu0 %v3418_v26 }
 0x941   : > { %3387 = vmatpush3.bf16.msra.mxu1 %v3386_v22  ;;  %3421 = vmatprep.subr.bf16.mxu0 %v3420_v36 }
 0x942   : > { %3389 = vmatprep.subr.bf16.mxu1 %v3388_v30 }
 0x944   : > { %3423 = vmatpush3.bf16.msra.mxu0 %v3422_v40 }
 0x945   : > { %3391 = vmatpush3.bf16.msra.mxu1 %v3390_v37  ;;  %3425 = vmatprep.subr.bf16.mxu0 %v3424_v43  ;;  %v1906_v43 = vsub.s32 1, %v1901_v9 }
 0x946   : > { %3393 = vmatprep.subr.bf16.mxu1 %v3392_v45 }
 0x947   : > { %v1907_v51 = vrot.slane %v1898_v14, %v1906_v43 }
 0x948   : > { %3427 = vmatpush3.bf16.msra.mxu0 %v3426_v49  ;;  %v1911_v49 = vrot.slane %v1898_v14, %v1910_v35 }
 0x949   : > { %3395 = vmatpush3.bf16.msra.mxu1 %v3394_v46  ;;  %3429 = vmatprep.subr.bf16.mxu0 %v3428_v59  ;;  %v1914_v46 = vsub.s32 3, %v1901_v9 }
 0x94a   : > { %3397 = vmatprep.subr.bf16.mxu1 %v3396_v53 }
 0x94b   : > { %v1915_v52 = vrot.slane %v1898_v14, %v1914_v46 }
 0x94c   : > { %3431 = vmatpush3.bf16.msra.mxu0 %v3430_v63 }
 0x94d   : > { %3399 = vmatpush3.bf16.msra.mxu1 %v3398_v60 }
 0x9e1   : > { %v4568_v2 = vpop.f32.mrb[12].mxu1  ;;  %v4570_v3 = vpop.f32.mrb[8].mxu0 }
 0x9e2   : > { %v4572_v4 = vpop.f32.mrb[13].mxu1  ;;  %v4574_v5 = vpop.f32.mrb[9].mxu0  ;;  %v2007_v61 = vadd.f32 %v4568_v2, %v1903_v47  ;;  %v2084_v9 = vadd.f32 %v4570_v3, %v1911_v49 }
 0x9e3   : > { %v2086_v14 = vadd.f32 %v4574_v5, %v1915_v52 }
 0x9e5   : > { %v4576_v6 = vpop.f32.mrb[14].mxu1  ;;  %v4578_v1 = vpop.f32.mrb[10].mxu0 }
 0x9e6   : > { %v4580_v7 = vpop.f32.mrb[15].mxu1  ;;  %v4582_v34 = vpop.f32.mrb[11].mxu0  ;;  %v2090_v5 = vadd.f32 %v4578_v1, %v1911_v49 }
 0xa01   : > { %v2160_v19 = vpop.f32.mrb[16].mxu1  ;;  %v2237_v20 = vpop.f32.mrb[12].mxu0 }
 0xa02   : > { %v2161_v21 = vadd.f32 %v2160_v19, %v1919_v15  ;;  %v2238_v22 = vadd.f32 %v2237_v20, %v1927_v16  ;;  %v2162_v23 = vpop.f32.mrb[17].mxu1  ;;  %v2239_v25 = vpop.f32.mrb[13].mxu0 }
 0xa03   : > { %v2163_v26 = vadd.f32 %v2162_v23, %v1923_v17  ;;  %v2240_v27 = vadd.f32 %v2239_v25, %v1931_v18  ;;  %v2013_v23 = vadd.f32 %v4576_v6, %v1903_v47 }
 0xa04   : > { %v2256_v28 = vmul.f32 0.70710677, %v2161_v21  ;;  %v2258_v29 = vmul.f32 0.70710677, %v2238_v22  ;;  %v2248_v53 = vmul.f32 0.5, %v2161_v21  ;;  %v2250_v58 = vmul.f32 0.5, %v2238_v22 }
 0xa05   : > { %v2257_v30 = vmul.f32 0.70710677, %v2163_v26  ;;  %v2259_v31 = vmul.f32 0.70710677, %v2240_v27  ;;  %v2166_v32 = vpop.f32.mrb[18].mxu1  ;;  %v2243_v33 = vpop.f32.mrb[14].mxu0 }
 0xa06   : > { %3610 = verf.f32 %v2256_v28  ;;  %v2167_v36 = vadd.f32 %v2166_v32, %v1919_v15  ;;  %v2244_v37 = vadd.f32 %v2243_v33, %v1927_v16  ;;  %v2168_v38 = vpop.f32.mrb[19].mxu1  ;;  %v2245_v39 = vpop.f32.mrb[15].mxu0  ;;  %v2249_v63 = vmul.f32 0.5, %v2163_v26 }
 0xa07   : > { %3612 = verf.f32 %v2258_v29  ;;  %v2169_v40 = vadd.f32 %v2168_v38, %v1923_v17  ;;  %v2246_v41 = vadd.f32 %v2245_v39, %v1931_v18  ;;  %v2251_v11 = vmul.f32 0.5, %v2240_v27 }
 0xa08   : > { %3614 = verf.f32 %v2257_v30  ;;  %v2260_v0 = vmul.f32 0.70710677, %v2167_v36  ;;  %v2262_v42 = vmul.f32 0.70710677, %v2244_v37  ;;  %v2009_v15 = vadd.f32 %v4572_v4, %v1907_v51 }
 0xa09   : > { %3616 = verf.f32 %v2259_v31  ;;  %v2261_v45 = vmul.f32 0.70710677, %v2169_v40  ;;  %v2263_v44 = vmul.f32 0.70710677, %v2246_v41  ;;  %v2252_v21 = vmul.f32 0.5, %v2167_v36 }
 0xa0a   : > { %3618 = verf.f32 %v2260_v0  ;;  %v2254_v25 = vmul.f32 0.5, %v2244_v37  ;;  %v2253_v29 = vmul.f32 0.5, %v2169_v40  ;;  %v2255_v32 = vmul.f32 0.5, %v2246_v41 }
 0xa0b   : > { %3620 = verf.f32 %v2262_v42  ;;  %v2015_v36 = vadd.f32 %v4580_v7, %v1907_v51  ;;  %v2092_v37 = vadd.f32 %v4582_v34, %v1915_v52  ;;  %v2768_v7 = vld [vmem:[%s4760_s18] ss:$0 sm:$0xff] }
 0xa0c   : > { %3622 = verf.f32 %v2261_v45 }
 0xa0d   : > { %3624 = verf.f32 %v2263_v44 }
 0xa10   : > { %v3611_v48 = vpop.eup %3610 }
 0xa11   : > { %v3613_v50 = vpop.eup %3612  ;;  %v2272_v54 = vadd.f32 1.0, %v3611_v48 }
 0xa12   : > { %v3615_v55 = vpop.eup %3614  ;;  %v2274_v59 = vadd.f32 1.0, %v3613_v50 }
 0xa13   : > { %v3617_v60 = vpop.eup %3616  ;;  %v2280_v62 = vmul.f32 %v2272_v54, %v2248_v53  ;;  %v2273_v8 = vadd.f32 1.0, %v3615_v55 }
 0xa14   : > { %v2282_v10 = vmul.f32 %v2274_v59, %v2250_v58  ;;  %v2275_v12 = vadd.f32 1.0, %v3617_v60  ;;  %v3619_v13 = vpop.eup %3618 }
 0xa15   : > { %v2288_v16 = vmul.f32 %v2280_v62, %v2007_v61  ;;  %v2281_v17 = vmul.f32 %v2273_v8, %v2249_v63  ;;  %v3621_v18 = vpop.eup %3620  ;;  %v2276_v2 = vadd.f32 1.0, %v3619_v13 }
 0xa16   : > { %v2290_v19 = vmul.f32 %v2282_v10, %v2084_v9  ;;  %v2283_v20 = vmul.f32 %v2275_v12, %v2251_v11  ;;  %v3623_v22 = vpop.eup %3622  ;;  %v2278_v3 = vadd.f32 1.0, %v3621_v18 }
 0xa17   : > { %v2289_v26 = vmul.f32 %v2281_v17, %v2009_v15  ;;  %v3625_v27 = vpop.eup %3624  ;;  %v2284_v28 = vmul.f32 %v2276_v2, %v2252_v21  ;;  %v2277_v30 = vadd.f32 1.0, %v3623_v22 }
 0xa18   : > { %v2291_v4 = vmul.f32 %v2283_v20, %v2086_v14  ;;  %v2286_v31 = vmul.f32 %v2278_v3, %v2254_v25  ;;  %v2279_v33 = vadd.f32 1.0, %v3625_v27 }
 0xa19   : > { %2431 = vmatprep.mubr.f32.mxu1 %v2289_v26  ;;  %v2285_v38 = vmul.f32 %v2277_v30, %v2253_v29  ;;  %v2292_v6 = vmul.f32 %v2284_v28, %v2013_v23 }
 0xa1a   : > { %2506 = vmatprep.mubr.f32.mxu0 %v2291_v4  ;;  %2432 = vmatmul.mubr.f32.vlgmr.msra.gmra.mrb[20].mxu1 %v2288_v16  ;;  %v2287_v39 = vmul.f32 %v2279_v33, %v2255_v32  ;;  %v2294_v0 = vmul.f32 %v2286_v31, %v2090_v5 }
 0xa1b   : > { %2507 = vmatmul.mubr.f32.vlgmr.msra.gmra.mrb[16].mxu0 %v2290_v19  ;;  %v2293_v40 = vmul.f32 %v2285_v38, %v2015_v36 }
 0xa1c   : > { %v2295_v42 = vmul.f32 %v2287_v39, %v2092_v37 }
 0xa1d   : > { %2436 = vmatprep.mubr.f32.mxu1 %v2293_v40 }
 0xa1e   : > { %2511 = vmatprep.mubr.f32.mxu0 %v2295_v42  ;;  %2437 = vmatmul.mubr.f32.gmra.mrb[22].mxu1 %v2292_v6 }
 0xa1f   : > { %2512 = vmatmul.mubr.f32.gmra.mrb[18].mxu0 %v2294_v0 }
 0xaed   : > { %v2894_v1 = vpop.f32.mrb[20].mxu1 }
 0xaee   : > { %v2932_v41 = vpop.f32.mrb[16].mxu0  ;;  %v2895_v45 = vpop.f32.mrb[21].mxu1 }
 0xaef   : > { %v2896_v24 = vadd.f32 %v2895_v45, %v2894_v1  ;;  %v2933_v34 = vpop.f32.mrb[17].mxu0 }
 0xaf0   : > { %v2934_v44 = vadd.f32 %v2933_v34, %v2932_v41 }
 0xaf1   : > { %v2434_v35 = vadd.f32 %v2896_v24, %v2768_v7  ;;  %v2897_v43 = vpop.f32.mrb[22].mxu1 }
 0xaf2   : > { %v2935_v47 = vpop.f32.mrb[18].mxu0  ;;  %v2898_v48 = vpop.f32.mrb[23].mxu1 }
 0xaf3   : > { %v2509_v46 = vadd.f32 %v2934_v44, %v2434_v35  ;;  %v2899_v49 = vadd.f32 %v2898_v48, %v2897_v43  ;;  %v2936_v50 = vpop.f32.mrb[19].mxu0 }
 0xaf4   : > { %v2937_v52 = vadd.f32 %v2936_v50, %v2935_v47 }
 0xaf5   : > { %v2517_v51 = vadd.f32 %v2509_v46, %v4526_v57  ;;  %v2439_v53 = vadd.f32 %v2899_v49, %v2768_v7 }
 0xaf7   : > { %2519 = vst [vmem:[%s638_s3] sm:$0xff] %v2517_v51  ;;  %v2514_v54 = vadd.f32 %v2937_v52, %v2439_v53 }
 0xaf9   : > { %v2518_v57 = vadd.f32 %v2514_v54, %v4523_v56 }
 0xafb   : > { %2520 = vst [vmem:[%s638_s3 + $0x8] sm:$0xff] %v2518_v57 }
 0xafc   : > { %3841 = shalt.err (!%p3838_p0)
}
 0xafd   : > { %s3842_s29 = scalar_lea.hbm %s4607_s13, 256  ;;  %s3846_s10 = scalar_lea.hbm %s4763_s5, 512 }
 0xafe   : > { %p3843_p8 = scmp.ne.s32.totalorder %s4607_s13, %s3842_s29  ;;  %p3847_p2 = scmp.lt.u32.totalorder %s4607_s13, %s4763_s5 }
 0xaff   : > { %p3848_p10 = scmp.lt.u32.totalorder %s3846_s10, %s3842_s29  ;;  %p3850_p7 = scmp.lt.u32.totalorder %s3842_s29, %s4607_s13 }
 0xb00   : > { %p3844_p3 = pnand %p3843_p8, %p4764_p6 }
 0xb01   : > { %p3849_p5 = por %p3848_p10, %p3847_p2 }
 0xb02   : > { %p3845_p11 = pneg %p3844_p3 }
 0xb03   : > { %p3851_p4 = por %p3850_p7, %p3849_p5 }
 0xb05   : > { %p3852_p1 = pnand %p3851_p4, %p3845_p11 }
 0xb07   : > { %3855 = shalt.err (!%p3852_p1)
}
 0xb08   : > { %s3940_s9 = smov 128   ;;  %s3941_s20 = smov 8  }
 0xb09   : > { %3454 = dma.vmem_to_hbm [thread:$0]  (%p4764_p6), %s4602_s19, 256, %s4607_s13, %s2522_s1, %s3940_s9, %s3940_s9, %s3941_s20  }
 0xb0a PF: > { %s4765_s25 = sld [smem:[#allocation20_spill]]  ;;  %s4766_s18 = sld [smem:[#allocation26_spill]] }
 0xb0b   : > { %s4767_s15 = sld [smem:[#allocation23_spill]] }
 0xb10   : > { %s2552_s3 = sand.u32 1, %s4765_s25   ;;  %p4768_p13 = scmp.ne.s32.totalorder %s4766_s18, 0 }
 0xb11   : > { %p4769_p12 = scmp.ge.s32.totalorder %s4767_s15, 2  ;;  %s2553_s21 = scalar_lea.sflag [#allocation4], %s2552_s3 }
 0xb13   : > { %p3480_p9 = pnand %p4769_p12, %p4768_p13 }
 0xb15   : > { %3897 = dma.done.wait (!%p3480_p9), %s2553_s21, 256  }
 0xb16   : > { %3899 = vsyncadd (!%p3480_p9), %s2553_s21, 4294967040  ;;  %s35_s18 = sadd.s32 1, %s4767_s15   ;;  %s4770_s26 = sld [smem:[#allocation21_spill]] }
 0xb17   : > { %p32_p0 = scmp.ge.s32.totalorder %s35_s18, 4   ;;  %s4771_s15 = sld [smem:[#allocation29_spill]] }
 0xb18   : > { %s4772_s8 = sld [smem:[#allocation27_spill]]  ;;  %s4773_s29 = smov %s3906_s30 }
 0xb19   : > { %s4775_s16 = smov %s3918_s17  ;;  %34 = sbr.rel (!%p32_p0) target bundleno = 22 (0x16), region = 161 }
 0xb1c   : > { %s4774_s30 = smov %s4770_s26 }
 0xb1e   : > { %s4776_s17 = smov %s4772_s8 }
 0xb20   :  { %2558 = vsyncpa [#allocation3], 1 }
 0xb21   :  { %2560 = vsyncpa [#allocation3 + $0x1], 1 }
 0xb22   :  { %2561 = vsyncpa [#allocation6], 1 }
 0xb23   :  { %2563 = vsyncpa [#allocation6 + $0x1], 1 }
 0xb24   :  { %2564 = vsyncpa [#allocation9], 1 }
 0xb25   :  { %2565 = vsyncpa [#allocation12], 1 }
 0xb26   :  { %2566 = vsyncpa [#allocation4], 1 }
 0xb27   :  { %2568 = vsyncpa [#allocation4 + $0x1], 1 }

</bundles_post_ra>
